<compile_context>
chip_gen: v6e
topology: v6e:2x2x1
jax: 0.10.0
libtpu: 0.0.40
codegen_flags: <defaults>
</compile_context>

<pallas_src>
import jax
import jax.numpy as jnp
import numpy as np
from jax import lax
from jax.experimental import pallas as pl
from jax.experimental.pallas import tpu as pltpu

EPS = 1e-5


def _vmem_limit_bytes():
    """Generation-aware scoped-VMEM limit (<=48 MiB on v7x, ~96 MiB otherwise)."""
    cap = 128 << 20
    try:
        info = pltpu.get_tpu_info()
        cap = int(getattr(info, "vmem_capacity_bytes", cap))
    except Exception:
        cap = 64 << 20  # conservative fallback
    return int(min(max(cap - (16 << 20), 16 << 20), 96 << 20))


def _pick_nb(n_batch, cin, hw):
    """Images packed per grid step: largest divisor of N under a small VMEM cap."""
    cap = max(1, (4 << 20) // max(1, 9 * cin * hw * 2))   # bf16 im2col budget
    cap = min(cap, 8, n_batch)
    nb = 1
    for d in range(1, cap + 1):
        if n_batch % d == 0:
            nb = d
    return nb


# --------------------------------------------------------------------------
# Fused kernel: (folded input BN) -> 3x3 conv (single MXU matmul over nb
# lane-packed images) -> bias -> ReLU -> partial BN statistics
# --------------------------------------------------------------------------
def _make_conv_bn_kernel(H, W, Cin, Cout, nb):
    HW = H * W
    LEFT = -(-(W + 1) // 128) * 128     # lane-aligned left halo margin
    RIGHT = W + 1                       # right/bottom halo margin

    def kernel(x_ref, isc_ref, ish_ref, w_ref, b_ref,
               y_ref, s_ref, ss_ref,
               zf_ref, pm_ref):
        # Zero only the halo margins, every step (cheap; keeps the grid axis
        # fully "parallel" -- no reliance on cross-step scratch persistence).
        zf_ref[:, 0:LEFT] = jnp.zeros((Cin, LEFT), jnp.float32)
        zf_ref[:, LEFT + HW:LEFT + HW + RIGHT] = jnp.zeros((Cin, RIGHT), jnp.float32)

        # Column-validity masks built once per step as (1, HW), broadcast in
        # jnp.where (row validity is handled by the zero margins).
        lane = lax.broadcasted_iota(jnp.int32, (1, HW), 1)
        if (W & (W - 1)) == 0:
            col = lane & (W - 1)
        else:
            col = lax.rem(lane, W)
        not_left = col > 0
        not_right = col < (W - 1)

        isc = isc_ref[...]
        ish = ish_ref[...]

        # Build the bf16 (9*Cin, nb*HW) im2col patch matrix, nb images packed
        # along lanes.  Each 3x3 tap is a static lane slice of the flat
        # zero-margined buffer, column-masked at the image borders.
        for i in range(nb):
            x = x_ref[i].astype(jnp.float32)                  # (Cin, HW)
            xn = x * isc + ish                                # folded BN of prev layer
            zf_ref[:, LEFT:LEFT + HW] = xn                    # lane-aligned unmasked store
            zf = zf_ref[...]
            for kh in range(3):
                for kw in range(3):
                    t = kh * 3 + kw
                    start = LEFT + (kh - 1) * W + (kw - 1)
                    piece = zf[:, start:start + HW]           # (Cin, HW)
                    if kw == 0:
                        piece = jnp.where(not_left, piece, 0.0)
                    elif kw == 2:
                        piece = jnp.where(not_right, piece, 0.0)
                    pm_ref[t * Cin:(t + 1) * Cin, i * HW:(i + 1) * HW] = (
                        piece.astype(jnp.bfloat16))

        # One MXU matmul over the whole 3x3xCin contraction, bf16 operands,
        # f32 accumulation.  Output (Cout, nb*HW) is lane-dense.
        acc = jnp.dot(w_ref[...], pm_ref[...],
                      preferred_element_type=jnp.float32)
        acc = jnp.maximum(acc + b_ref[...], 0.0)              # bias + ReLU

        for i in range(nb):
            y_ref[i] = acc[:, i * HW:(i + 1) * HW].astype(y_ref.dtype)

        # Per-step partial BatchNorm statistics; combined outside the kernel
        # so every grid step is independent (megacore-friendly on v7x).
        s_ref[0] = jnp.sum(acc, axis=1, keepdims=True)
        ss_ref[0] = jnp.sum(acc * acc, axis=1, keepdims=True)

    return kernel


def _conv_bn_pass(x_flat, in_scale, in_shift, w, b, H, W):
    N, Cin, HW = x_flat.shape
    Cout = w.shape[0]
    nb = _pick_nb(N, Cin, HW)
    G = N // nb
    kernel = _make_conv_bn_kernel(H, W, Cin, Cout, nb)

    LEFT = -(-(W + 1) // 128) * 128
    RIGHT = W + 1

    grid_spec = pltpu.PrefetchScalarGridSpec(
        num_scalar_prefetch=0,
        grid=(G,),
        in_specs=[
            pl.BlockSpec((nb, Cin, HW), lambda g: (g, 0, 0)),   # activations
            pl.BlockSpec((Cin, 1), lambda g: (0, 0)),           # folded BN scale
            pl.BlockSpec((Cin, 1), lambda g: (0, 0)),           # folded BN shift
            pl.BlockSpec((Cout, 9 * Cin), lambda g: (0, 0)),    # conv weight (bf16)
            pl.BlockSpec((Cout, 1), lambda g: (0, 0)),          # bias
        ],
        out_specs=(
            pl.BlockSpec((nb, Cout, HW), lambda g: (g, 0, 0)),  # y (bf16, lane-dense)
            pl.BlockSpec((1, Cout, 1), lambda g: (g, 0, 0)),    # partial sum
            pl.BlockSpec((1, Cout, 1), lambda g: (g, 0, 0)),    # partial sum-sq
        ),
        scratch_shapes=[
            pltpu.VMEM((Cin, LEFT + HW + RIGHT), jnp.float32),  # flat halo buffer
            pltpu.VMEM((9 * Cin, nb * HW), jnp.bfloat16),       # bf16 im2col patches
        ],
    )

    cost = pl.CostEstimate(
        flops=2 * N * HW * Cout * 9 * Cin,
        transcendentals=0,
        bytes_accessed=(N * Cin * HW * x_flat.dtype.itemsize    # activations in
                        + N * Cout * HW * 2                     # activations out (bf16)
                        + Cout * 9 * Cin * 2                    # weights (bf16)
                        + 2 * G * Cout * 4))                    # partial stats

    return pl.pallas_call(
        kernel,
        out_shape=(jax.ShapeDtypeStruct((N, Cout, HW), jnp.bfloat16),
                   jax.ShapeDtypeStruct((G, Cout, 1), jnp.float32),
                   jax.ShapeDtypeStruct((G, Cout, 1), jnp.float32)),
        grid_spec=grid_spec,
        cost_estimate=cost,
        compiler_params=pltpu.CompilerParams(
            dimension_semantics=("parallel",),
            vmem_limit_bytes=_vmem_limit_bytes()),
    )(x_flat, in_scale, in_shift, w, b)


def _finalize_bn(partial_sum, partial_ss, gamma, beta, count):
    """Combine per-step partial stats into BN scale/shift (tiny XLA op)."""
    s = jnp.sum(partial_sum, axis=0)                 # (Cout, 1)
    ss = jnp.sum(partial_ss, axis=0)                 # (Cout, 1)
    mean = s / count
    var = jnp.maximum(ss / count - mean * mean, 0.0)
    scale = gamma * lax.rsqrt(var + EPS)
    shift = beta - mean * scale
    return scale, shift                              # (Cout, 1) each, f32


# --------------------------------------------------------------------------
# Module wrapper (NCHW in / NCHW out, like PyTorch) -- 2 pallas_calls total
# --------------------------------------------------------------------------
def double_conv_bn_relu(x_nchw, params):
    N, Cin, H, W = x_nchw.shape
    HW = H * W
    x_flat = x_nchw.reshape(N, Cin, HW)              # free row-major reshape
    id_sc = jnp.ones((Cin, 1), jnp.float32)
    id_sh = jnp.zeros((Cin, 1), jnp.float32)

    # conv1 + ReLU + partial BN1 stats
    y1, s1, ss1 = _conv_bn_pass(x_flat, id_sc, id_sh,
                                params["w1"], params["b1"], H, W)
    sc1, sh1 = _finalize_bn(s1, ss1, params["g1"], params["bt1"], float(N * HW))

    # BN1 apply folded into conv2's input stage (no HBM round-trip of the
    # normalized intermediate); conv2 + ReLU + partial BN2 stats
    y2, s2, ss2 = _conv_bn_pass(y1, sc1, sh1,
                                params["w2"], params["b2"], H, W)
    sc2, sh2 = _finalize_bn(s2, ss2, params["g2"], params["bt2"], float(N * HW))

    # BN2 apply: pure memory-bound affine -> plain jnp, fused by XLA.
    out = (y2.astype(jnp.float32) * sc2.reshape(1, -1, 1) + sh2.reshape(1, -1, 1))
    return out.reshape(N, -1, H, W)                  # free reshape to NCHW


def pt_weight_to_mat(w_pt):
    """(Cout, Cin, 3, 3) PyTorch conv weight -> (Cout, 9*Cin) bf16 matrix.

    Column order is (kh*3 + kw)*Cin + cin, matching the in-kernel im2col."""
    Cout, Cin = w_pt.shape[0], w_pt.shape[1]
    return (jnp.transpose(w_pt, (0, 2, 3, 1))
            .reshape(Cout, 9 * Cin).astype(jnp.bfloat16))


# --------------------------------------------------------------------------
# Pure-JAX (f32) reference for verification
# --------------------------------------------------------------------------
def ref_forward(x, w1, b1, g1, bt1, w2, b2, g2, bt2):
    def conv_relu(x, w, b):
        y = lax.conv_general_dilated(
            x, w, (1, 1), "SAME",
            dimension_numbers=("NCHW", "OIHW", "NCHW"))
        return jnp.maximum(y + b.reshape(1, -1, 1, 1), 0.0)

    def bn(y, g, bt):
        m = jnp.mean(y, axis=(0, 2, 3), keepdims=True)
        v = jnp.mean((y - m) ** 2, axis=(0, 2, 3), keepdims=True)
        return ((y - m) * lax.rsqrt(v + EPS) * g.reshape(1, -1, 1, 1)
                + bt.reshape(1, -1, 1, 1))

    y = bn(conv_relu(x, w1, b1), g1, bt1)
    y = bn(conv_relu(y, w2, b2), g2, bt2)
    return y


if __name__ == "__main__":
    N, Cin, Cout, H, W = 2, 4, 8, 16, 16

    key = jax.random.PRNGKey(0)
    kx, kw1, kb1, kw2, kb2 = jax.random.split(key, 5)

    x = jax.random.normal(kx, (N, Cin, H, W), jnp.float32)

    # Deterministic parameter init (synthetic; shapes match nn.Conv2d / nn.BatchNorm2d)
    w1_pt = jax.random.normal(kw1, (Cout, Cin, 3, 3), jnp.float32) * 0.1
    b1 = jax.random.normal(kb1, (Cout,), jnp.float32) * 0.1
    w2_pt = jax.random.normal(kw2, (Cout, Cout, 3, 3), jnp.float32) * 0.1
    b2 = jax.random.normal(kb2, (Cout,), jnp.float32) * 0.1
    g1 = jnp.ones((Cout,), jnp.float32)
    bt1 = jnp.zeros((Cout,), jnp.float32)
    g2 = jnp.ones((Cout,), jnp.float32)
    bt2 = jnp.zeros((Cout,), jnp.float32)

    params = dict(
        w1=pt_weight_to_mat(w1_pt), b1=b1.reshape(Cout, 1),
        g1=g1.reshape(Cout, 1), bt1=bt1.reshape(Cout, 1),
        w2=pt_weight_to_mat(w2_pt), b2=b2.reshape(Cout, 1),
        g2=g2.reshape(Cout, 1), bt2=bt2.reshape(Cout, 1),
    )

    out = jax.jit(double_conv_bn_relu)(x, params)
    out = jax.block_until_ready(out)

    ref = ref_forward(x, w1_pt, b1, g1, bt1, w2_pt, b2, g2, bt2)
    # bf16 MXU operands + bf16 inter-pass intermediates -> loose tolerance vs
    # the f32 reference; post-BN outputs are ~unit scale, so 0.1 abs is well
    # above bf16 rounding noise while still catching structural bugs.
    np.testing.assert_allclose(np.asarray(out), np.asarray(ref),
                               atol=1e-1, rtol=1e-1)

    print("KERNEL_OK")
</pallas_src>

<mosaic_0001>
module attributes {stable_mosaic.version = 11 : i64} {
  func.func @kernel(%arg0: i32, %arg1: memref<2x4x256xf32, #tpu.memory_space<vmem>>, %arg2: memref<4x1xf32, #tpu.memory_space<vmem>>, %arg3: memref<4x1xf32, #tpu.memory_space<vmem>>, %arg4: memref<8x36xbf16, #tpu.memory_space<vmem>>, %arg5: memref<8x1xf32, #tpu.memory_space<vmem>>, %arg6: memref<2x8x256xbf16, #tpu.memory_space<vmem>>, %arg7: memref<1x8x1xf32, #tpu.memory_space<vmem>>, %arg8: memref<1x8x1xf32, #tpu.memory_space<vmem>>, %arg9: memref<4x401xf32, #tpu.memory_space<vmem>>, %arg10: memref<36x512xbf16, #tpu.memory_space<vmem>>) attributes {dimension_semantics = [#tpu.dimension_semantics<parallel>], iteration_bounds = array<i64: 1>, scalar_prefetch = 0 : i64, scratch_operands = 2 : i64, tpu.core_type = #tpu.core_type<tc>, window_params = [{transform_indices = @transform_0, window_bounds = array<i64: 2, 4, 256>}, {pipeline_mode = #tpu.pipeline_mode<synchronous>, transform_indices = @transform_1, window_bounds = array<i64: 4, 1>}, {pipeline_mode = #tpu.pipeline_mode<synchronous>, transform_indices = @transform_2, window_bounds = array<i64: 4, 1>}, {pipeline_mode = #tpu.pipeline_mode<synchronous>, transform_indices = @transform_3, window_bounds = array<i64: 8, 36>}, {pipeline_mode = #tpu.pipeline_mode<synchronous>, transform_indices = @transform_4, window_bounds = array<i64: 8, 1>}, {transform_indices = @transform_5, window_bounds = array<i64: 2, 8, 256>}, {transform_indices = @transform_6, window_bounds = array<i64: 1, 8, 1>}, {transform_indices = @transform_7, window_bounds = array<i64: 1, 8, 1>}]} {
    %cst = arith.constant 0.000000e+00 : f32
    %0 = vector.broadcast %cst : f32 to vector<4x128xf32>
    %c0 = arith.constant 0 : index
    %c0_0 = arith.constant 0 : index
    %1 = vector.load %arg9[%c0, %c0_0] : memref<4x401xf32, #tpu.memory_space<vmem>>, vector<4x128xf32>
    tpu.vector_store %arg9[%c0, %c0_0], %0 {strides = array<i32>} : memref<4x401xf32, #tpu.memory_space<vmem>>, vector<4x128xf32>,
    %cst_1 = arith.constant 0.000000e+00 : f32
    %2 = vector.broadcast %cst_1 : f32 to vector<4x17xf32>
    %c0_2 = arith.constant 0 : index
    %c384 = arith.constant 384 : index
    %3 = vector.load %arg9[%c0_2, %c384] : memref<4x401xf32, #tpu.memory_space<vmem>>, vector<4x17xf32>
    tpu.vector_store %arg9[%c0_2, %c384], %2 {strides = array<i32>} : memref<4x401xf32, #tpu.memory_space<vmem>>, vector<4x17xf32>,
    %4 = tpu.iota {dimensions = array<i32: 1>} : vector<1x256xi32>
    %c15_i32 = arith.constant 15 : i32
    %5 = vector.broadcast %c15_i32 : i32 to vector<1x256xi32>
    %6 = arith.andi %4, %5 : vector<1x256xi32>
    %c0_i32 = arith.constant 0 : i32
    %7 = vector.broadcast %c0_i32 : i32 to vector<1x256xi32>
    %8 = arith.cmpi sgt, %6, %7 : vector<1x256xi32>
    %c15_i32_3 = arith.constant 15 : i32
    %9 = vector.broadcast %c15_i32_3 : i32 to vector<1x256xi32>
    %10 = arith.cmpi slt, %6, %9 : vector<1x256xi32>
    %c0_4 = arith.constant 0 : index
    %c0_5 = arith.constant 0 : index
    %11 = vector.load %arg2[%c0_4, %c0_5] : memref<4x1xf32, #tpu.memory_space<vmem>>, vector<4x1xf32>
    %c0_6 = arith.constant 0 : index
    %c0_7 = arith.constant 0 : index
    %12 = vector.load %arg3[%c0_6, %c0_7] : memref<4x1xf32, #tpu.memory_space<vmem>>, vector<4x1xf32>
    %c0_8 = arith.constant 0 : index
    %c0_9 = arith.constant 0 : index
    %c0_10 = arith.constant 0 : index
    %13 = vector.load %arg1[%c0_8, %c0_9, %c0_10] : memref<2x4x256xf32, #tpu.memory_space<vmem>>, vector<1x4x256xf32>
    %14 = vector.shape_cast %13 : vector<1x4x256xf32> to vector<4x256xf32>
    %15 = vector.broadcast %11 : vector<4x1xf32> to vector<4x256xf32>
    %16 = arith.mulf %14, %15 : vector<4x256xf32>
    %17 = vector.broadcast %12 : vector<4x1xf32> to vector<4x256xf32>
    %18 = arith.addf %16, %17 : vector<4x256xf32>
    %c0_11 = arith.constant 0 : index
    %c128 = arith.constant 128 : index
    %19 = vector.load %arg9[%c0_11, %c128] : memref<4x401xf32, #tpu.memory_space<vmem>>, vector<4x256xf32>
    tpu.vector_store %arg9[%c0_11, %c128], %18 {strides = array<i32>} : memref<4x401xf32, #tpu.memory_space<vmem>>, vector<4x256xf32>,
    %c0_12 = arith.constant 0 : index
    %c0_13 = arith.constant 0 : index
    %20 = vector.load %arg9[%c0_12, %c0_13] : memref<4x401xf32, #tpu.memory_space<vmem>>, vector<4x401xf32>
    %21 = vector.extract_strided_slice %20 {offsets = [0, 111], sizes = [4, 256], strides = [1, 1]} : vector<4x401xf32> to vector<4x256xf32>
    %cst_14 = arith.constant 0.000000e+00 : f32
    %22 = vector.shape_cast %8 : vector<1x256xi1> to vector<1x256xi1>
    %23 = vector.broadcast %22 : vector<1x256xi1> to vector<4x256xi1>
    %24 = vector.broadcast %cst_14 : f32 to vector<4x256xf32>
    %25 = arith.select %23, %21, %24 : vector<4x256xi1>, vector<4x256xf32>
    %26 = arith.truncf %25 : vector<4x256xf32> to vector<4x256xbf16>
    %c0_15 = arith.constant 0 : index
    %c0_16 = arith.constant 0 : index
    %27 = vector.load %arg10[%c0_15, %c0_16] : memref<36x512xbf16, #tpu.memory_space<vmem>>, vector<4x256xbf16>
    tpu.vector_store %arg10[%c0_15, %c0_16], %26 {strides = array<i32>} : memref<36x512xbf16, #tpu.memory_space<vmem>>, vector<4x256xbf16>,
    %28 = vector.extract_strided_slice %20 {offsets = [0, 112], sizes = [4, 256], strides = [1, 1]} : vector<4x401xf32> to vector<4x256xf32>
    %29 = arith.truncf %28 : vector<4x256xf32> to vector<4x256xbf16>
    %c4 = arith.constant 4 : index
    %c0_17 = arith.constant 0 : index
    %30 = vector.load %arg10[%c4, %c0_17] : memref<36x512xbf16, #tpu.memory_space<vmem>>, vector<4x256xbf16>
    tpu.vector_store %arg10[%c4, %c0_17], %29 {strides = array<i32>} : memref<36x512xbf16, #tpu.memory_space<vmem>>, vector<4x256xbf16>,
    %31 = vector.extract_strided_slice %20 {offsets = [0, 113], sizes = [4, 256], strides = [1, 1]} : vector<4x401xf32> to vector<4x256xf32>
    %cst_18 = arith.constant 0.000000e+00 : f32
    %32 = vector.shape_cast %10 : vector<1x256xi1> to vector<1x256xi1>
    %33 = vector.broadcast %32 : vector<1x256xi1> to vector<4x256xi1>
    %34 = vector.broadcast %cst_18 : f32 to vector<4x256xf32>
    %35 = arith.select %33, %31, %34 : vector<4x256xi1>, vector<4x256xf32>
    %36 = arith.truncf %35 : vector<4x256xf32> to vector<4x256xbf16>
    %c8 = arith.constant 8 : index
    %c0_19 = arith.constant 0 : index
    %37 = vector.load %arg10[%c8, %c0_19] : memref<36x512xbf16, #tpu.memory_space<vmem>>, vector<4x256xbf16>
    tpu.vector_store %arg10[%c8, %c0_19], %36 {strides = array<i32>} : memref<36x512xbf16, #tpu.memory_space<vmem>>, vector<4x256xbf16>,
    %38 = vector.extract_strided_slice %20 {offsets = [0, 127], sizes = [4, 256], strides = [1, 1]} : vector<4x401xf32> to vector<4x256xf32>
    %cst_20 = arith.constant 0.000000e+00 : f32
    %39 = vector.shape_cast %8 : vector<1x256xi1> to vector<1x256xi1>
    %40 = vector.broadcast %39 : vector<1x256xi1> to vector<4x256xi1>
    %41 = vector.broadcast %cst_20 : f32 to vector<4x256xf32>
    %42 = arith.select %40, %38, %41 : vector<4x256xi1>, vector<4x256xf32>
    %43 = arith.truncf %42 : vector<4x256xf32> to vector<4x256xbf16>
    %c12 = arith.constant 12 : index
    %c0_21 = arith.constant 0 : index
    %44 = vector.load %arg10[%c12, %c0_21] : memref<36x512xbf16, #tpu.memory_space<vmem>>, vector<4x256xbf16>
    tpu.vector_store %arg10[%c12, %c0_21], %43 {strides = array<i32>} : memref<36x512xbf16, #tpu.memory_space<vmem>>, vector<4x256xbf16>,
    %45 = vector.extract_strided_slice %20 {offsets = [0, 128], sizes = [4, 256], strides = [1, 1]} : vector<4x401xf32> to vector<4x256xf32>
    %46 = arith.truncf %45 : vector<4x256xf32> to vector<4x256xbf16>
    %c16 = arith.constant 16 : index
    %c0_22 = arith.constant 0 : index
    %47 = vector.load %arg10[%c16, %c0_22] : memref<36x512xbf16, #tpu.memory_space<vmem>>, vector<4x256xbf16>
    tpu.vector_store %arg10[%c16, %c0_22], %46 {strides = array<i32>} : memref<36x512xbf16, #tpu.memory_space<vmem>>, vector<4x256xbf16>,
    %48 = vector.extract_strided_slice %20 {offsets = [0, 129], sizes = [4, 256], strides = [1, 1]} : vector<4x401xf32> to vector<4x256xf32>
    %cst_23 = arith.constant 0.000000e+00 : f32
    %49 = vector.shape_cast %10 : vector<1x256xi1> to vector<1x256xi1>
    %50 = vector.broadcast %49 : vector<1x256xi1> to vector<4x256xi1>
    %51 = vector.broadcast %cst_23 : f32 to vector<4x256xf32>
    %52 = arith.select %50, %48, %51 : vector<4x256xi1>, vector<4x256xf32>
    %53 = arith.truncf %52 : vector<4x256xf32> to vector<4x256xbf16>
    %c20 = arith.constant 20 : index
    %c0_24 = arith.constant 0 : index
    %54 = vector.load %arg10[%c20, %c0_24] : memref<36x512xbf16, #tpu.memory_space<vmem>>, vector<4x256xbf16>
    tpu.vector_store %arg10[%c20, %c0_24], %53 {strides = array<i32>} : memref<36x512xbf16, #tpu.memory_space<vmem>>, vector<4x256xbf16>,
    %55 = vector.extract_strided_slice %20 {offsets = [0, 143], sizes = [4, 256], strides = [1, 1]} : vector<4x401xf32> to vector<4x256xf32>
    %cst_25 = arith.constant 0.000000e+00 : f32
    %56 = vector.shape_cast %8 : vector<1x256xi1> to vector<1x256xi1>
    %57 = vector.broadcast %56 : vector<1x256xi1> to vector<4x256xi1>
    %58 = vector.broadcast %cst_25 : f32 to vector<4x256xf32>
    %59 = arith.select %57, %55, %58 : vector<4x256xi1>, vector<4x256xf32>
    %60 = arith.truncf %59 : vector<4x256xf32> to vector<4x256xbf16>
    %c24 = arith.constant 24 : index
    %c0_26 = arith.constant 0 : index
    %61 = vector.load %arg10[%c24, %c0_26] : memref<36x512xbf16, #tpu.memory_space<vmem>>, vector<4x256xbf16>
    tpu.vector_store %arg10[%c24, %c0_26], %60 {strides = array<i32>} : memref<36x512xbf16, #tpu.memory_space<vmem>>, vector<4x256xbf16>,
    %62 = vector.extract_strided_slice %20 {offsets = [0, 144], sizes = [4, 256], strides = [1, 1]} : vector<4x401xf32> to vector<4x256xf32>
    %63 = arith.truncf %62 : vector<4x256xf32> to vector<4x256xbf16>
    %c28 = arith.constant 28 : index
    %c0_27 = arith.constant 0 : index
    %64 = vector.load %arg10[%c28, %c0_27] : memref<36x512xbf16, #tpu.memory_space<vmem>>, vector<4x256xbf16>
    tpu.vector_store %arg10[%c28, %c0_27], %63 {strides = array<i32>} : memref<36x512xbf16, #tpu.memory_space<vmem>>, vector<4x256xbf16>,
    %65 = vector.extract_strided_slice %20 {offsets = [0, 145], sizes = [4, 256], strides = [1, 1]} : vector<4x401xf32> to vector<4x256xf32>
    %cst_28 = arith.constant 0.000000e+00 : f32
    %66 = vector.shape_cast %10 : vector<1x256xi1> to vector<1x256xi1>
    %67 = vector.broadcast %66 : vector<1x256xi1> to vector<4x256xi1>
    %68 = vector.broadcast %cst_28 : f32 to vector<4x256xf32>
    %69 = arith.select %67, %65, %68 : vector<4x256xi1>, vector<4x256xf32>
    %70 = arith.truncf %69 : vector<4x256xf32> to vector<4x256xbf16>
    %c32 = arith.constant 32 : index
    %c0_29 = arith.constant 0 : index
    %71 = vector.load %arg10[%c32, %c0_29] : memref<36x512xbf16, #tpu.memory_space<vmem>>, vector<4x256xbf16>
    tpu.vector_store %arg10[%c32, %c0_29], %70 {strides = array<i32>} : memref<36x512xbf16, #tpu.memory_space<vmem>>, vector<4x256xbf16>,
    %c1 = arith.constant 1 : index
    %c0_30 = arith.constant 0 : index
    %c0_31 = arith.constant 0 : index
    %72 = vector.load %arg1[%c1, %c0_30, %c0_31] : memref<2x4x256xf32, #tpu.memory_space<vmem>>, vector<1x4x256xf32>
    %73 = vector.shape_cast %72 : vector<1x4x256xf32> to vector<4x256xf32>
    %74 = vector.broadcast %11 : vector<4x1xf32> to vector<4x256xf32>
    %75 = arith.mulf %73, %74 : vector<4x256xf32>
    %76 = vector.broadcast %12 : vector<4x1xf32> to vector<4x256xf32>
    %77 = arith.addf %75, %76 : vector<4x256xf32>
    %c0_32 = arith.constant 0 : index
    %c128_33 = arith.constant 128 : index
    %78 = vector.load %arg9[%c0_32, %c128_33] : memref<4x401xf32, #tpu.memory_space<vmem>>, vector<4x256xf32>
    tpu.vector_store %arg9[%c0_32, %c128_33], %77 {strides = array<i32>} : memref<4x401xf32, #tpu.memory_space<vmem>>, vector<4x256xf32>,
    %c0_34 = arith.constant 0 : index
    %c0_35 = arith.constant 0 : index
    %79 = vector.load %arg9[%c0_34, %c0_35] : memref<4x401xf32, #tpu.memory_space<vmem>>, vector<4x401xf32>
    %80 = vector.extract_strided_slice %79 {offsets = [0, 111], sizes = [4, 256], strides = [1, 1]} : vector<4x401xf32> to vector<4x256xf32>
    %cst_36 = arith.constant 0.000000e+00 : f32
    %81 = vector.shape_cast %8 : vector<1x256xi1> to vector<1x256xi1>
    %82 = vector.broadcast %81 : vector<1x256xi1> to vector<4x256xi1>
    %83 = vector.broadcast %cst_36 : f32 to vector<4x256xf32>
    %84 = arith.select %82, %80, %83 : vector<4x256xi1>, vector<4x256xf32>
    %85 = arith.truncf %84 : vector<4x256xf32> to vector<4x256xbf16>
    %c0_37 = arith.constant 0 : index
    %c256 = arith.constant 256 : index
    %86 = vector.load %arg10[%c0_37, %c256] : memref<36x512xbf16, #tpu.memory_space<vmem>>, vector<4x256xbf16>
    tpu.vector_store %arg10[%c0_37, %c256], %85 {strides = array<i32>} : memref<36x512xbf16, #tpu.memory_space<vmem>>, vector<4x256xbf16>,
    %87 = vector.extract_strided_slice %79 {offsets = [0, 112], sizes = [4, 256], strides = [1, 1]} : vector<4x401xf32> to vector<4x256xf32>
    %88 = arith.truncf %87 : vector<4x256xf32> to vector<4x256xbf16>
    %c4_38 = arith.constant 4 : index
    %c256_39 = arith.constant 256 : index
    %89 = vector.load %arg10[%c4_38, %c256_39] : memref<36x512xbf16, #tpu.memory_space<vmem>>, vector<4x256xbf16>
    tpu.vector_store %arg10[%c4_38, %c256_39], %88 {strides = array<i32>} : memref<36x512xbf16, #tpu.memory_space<vmem>>, vector<4x256xbf16>,
    %90 = vector.extract_strided_slice %79 {offsets = [0, 113], sizes = [4, 256], strides = [1, 1]} : vector<4x401xf32> to vector<4x256xf32>
    %cst_40 = arith.constant 0.000000e+00 : f32
    %91 = vector.shape_cast %10 : vector<1x256xi1> to vector<1x256xi1>
    %92 = vector.broadcast %91 : vector<1x256xi1> to vector<4x256xi1>
    %93 = vector.broadcast %cst_40 : f32 to vector<4x256xf32>
    %94 = arith.select %92, %90, %93 : vector<4x256xi1>, vector<4x256xf32>
    %95 = arith.truncf %94 : vector<4x256xf32> to vector<4x256xbf16>
    %c8_41 = arith.constant 8 : index
    %c256_42 = arith.constant 256 : index
    %96 = vector.load %arg10[%c8_41, %c256_42] : memref<36x512xbf16, #tpu.memory_space<vmem>>, vector<4x256xbf16>
    tpu.vector_store %arg10[%c8_41, %c256_42], %95 {strides = array<i32>} : memref<36x512xbf16, #tpu.memory_space<vmem>>, vector<4x256xbf16>,
    %97 = vector.extract_strided_slice %79 {offsets = [0, 127], sizes = [4, 256], strides = [1, 1]} : vector<4x401xf32> to vector<4x256xf32>
    %cst_43 = arith.constant 0.000000e+00 : f32
    %98 = vector.shape_cast %8 : vector<1x256xi1> to vector<1x256xi1>
    %99 = vector.broadcast %98 : vector<1x256xi1> to vector<4x256xi1>
    %100 = vector.broadcast %cst_43 : f32 to vector<4x256xf32>
    %101 = arith.select %99, %97, %100 : vector<4x256xi1>, vector<4x256xf32>
    %102 = arith.truncf %101 : vector<4x256xf32> to vector<4x256xbf16>
    %c12_44 = arith.constant 12 : index
    %c256_45 = arith.constant 256 : index
    %103 = vector.load %arg10[%c12_44, %c256_45] : memref<36x512xbf16, #tpu.memory_space<vmem>>, vector<4x256xbf16>
    tpu.vector_store %arg10[%c12_44, %c256_45], %102 {strides = array<i32>} : memref<36x512xbf16, #tpu.memory_space<vmem>>, vector<4x256xbf16>,
    %104 = vector.extract_strided_slice %79 {offsets = [0, 128], sizes = [4, 256], strides = [1, 1]} : vector<4x401xf32> to vector<4x256xf32>
    %105 = arith.truncf %104 : vector<4x256xf32> to vector<4x256xbf16>
    %c16_46 = arith.constant 16 : index
    %c256_47 = arith.constant 256 : index
    %106 = vector.load %arg10[%c16_46, %c256_47] : memref<36x512xbf16, #tpu.memory_space<vmem>>, vector<4x256xbf16>
    tpu.vector_store %arg10[%c16_46, %c256_47], %105 {strides = array<i32>} : memref<36x512xbf16, #tpu.memory_space<vmem>>, vector<4x256xbf16>,
    %107 = vector.extract_strided_slice %79 {offsets = [0, 129], sizes = [4, 256], strides = [1, 1]} : vector<4x401xf32> to vector<4x256xf32>
    %cst_48 = arith.constant 0.000000e+00 : f32
    %108 = vector.shape_cast %10 : vector<1x256xi1> to vector<1x256xi1>
    %109 = vector.broadcast %108 : vector<1x256xi1> to vector<4x256xi1>
    %110 = vector.broadcast %cst_48 : f32 to vector<4x256xf32>
    %111 = arith.select %109, %107, %110 : vector<4x256xi1>, vector<4x256xf32>
    %112 = arith.truncf %111 : vector<4x256xf32> to vector<4x256xbf16>
    %c20_49 = arith.constant 20 : index
    %c256_50 = arith.constant 256 : index
    %113 = vector.load %arg10[%c20_49, %c256_50] : memref<36x512xbf16, #tpu.memory_space<vmem>>, vector<4x256xbf16>
    tpu.vector_store %arg10[%c20_49, %c256_50], %112 {strides = array<i32>} : memref<36x512xbf16, #tpu.memory_space<vmem>>, vector<4x256xbf16>,
    %114 = vector.extract_strided_slice %79 {offsets = [0, 143], sizes = [4, 256], strides = [1, 1]} : vector<4x401xf32> to vector<4x256xf32>
    %cst_51 = arith.constant 0.000000e+00 : f32
    %115 = vector.shape_cast %8 : vector<1x256xi1> to vector<1x256xi1>
    %116 = vector.broadcast %115 : vector<1x256xi1> to vector<4x256xi1>
    %117 = vector.broadcast %cst_51 : f32 to vector<4x256xf32>
    %118 = arith.select %116, %114, %117 : vector<4x256xi1>, vector<4x256xf32>
    %119 = arith.truncf %118 : vector<4x256xf32> to vector<4x256xbf16>
    %c24_52 = arith.constant 24 : index
    %c256_53 = arith.constant 256 : index
    %120 = vector.load %arg10[%c24_52, %c256_53] : memref<36x512xbf16, #tpu.memory_space<vmem>>, vector<4x256xbf16>
    tpu.vector_store %arg10[%c24_52, %c256_53], %119 {strides = array<i32>} : memref<36x512xbf16, #tpu.memory_space<vmem>>, vector<4x256xbf16>,
    %121 = vector.extract_strided_slice %79 {offsets = [0, 144], sizes = [4, 256], strides = [1, 1]} : vector<4x401xf32> to vector<4x256xf32>
    %122 = arith.truncf %121 : vector<4x256xf32> to vector<4x256xbf16>
    %c28_54 = arith.constant 28 : index
    %c256_55 = arith.constant 256 : index
    %123 = vector.load %arg10[%c28_54, %c256_55] : memref<36x512xbf16, #tpu.memory_space<vmem>>, vector<4x256xbf16>
    tpu.vector_store %arg10[%c28_54, %c256_55], %122 {strides = array<i32>} : memref<36x512xbf16, #tpu.memory_space<vmem>>, vector<4x256xbf16>,
    %124 = vector.extract_strided_slice %79 {offsets = [0, 145], sizes = [4, 256], strides = [1, 1]} : vector<4x401xf32> to vector<4x256xf32>
    %cst_56 = arith.constant 0.000000e+00 : f32
    %125 = vector.shape_cast %10 : vector<1x256xi1> to vector<1x256xi1>
    %126 = vector.broadcast %125 : vector<1x256xi1> to vector<4x256xi1>
    %127 = vector.broadcast %cst_56 : f32 to vector<4x256xf32>
    %128 = arith.select %126, %124, %127 : vector<4x256xi1>, vector<4x256xf32>
    %129 = arith.truncf %128 : vector<4x256xf32> to vector<4x256xbf16>
    %c32_57 = arith.constant 32 : index
    %c256_58 = arith.constant 256 : index
    %130 = vector.load %arg10[%c32_57, %c256_58] : memref<36x512xbf16, #tpu.memory_space<vmem>>, vector<4x256xbf16>
    tpu.vector_store %arg10[%c32_57, %c256_58], %129 {strides = array<i32>} : memref<36x512xbf16, #tpu.memory_space<vmem>>, vector<4x256xbf16>,
    %c0_59 = arith.constant 0 : index
    %c0_60 = arith.constant 0 : index
    %131 = vector.load %arg4[%c0_59, %c0_60] : memref<8x36xbf16, #tpu.memory_space<vmem>>, vector<8x36xbf16>
    %c0_61 = arith.constant 0 : index
    %c0_62 = arith.constant 0 : index
    %132 = vector.load %arg10[%c0_61, %c0_62] : memref<36x512xbf16, #tpu.memory_space<vmem>>, vector<36x512xbf16>
    %cst_63 = arith.constant dense<0.000000e+00> : vector<8x512xf32>
    %133 = tpu.matmul %131, %132, %cst_63 {dimension_numbers = #tpu.dot_dimension_numbers<[1], [0], [0], [1], [0, 0, 1, 1], [], []>} : vector<8x36xbf16>, vector<36x512xbf16>, vector<8x512xf32> -> vector<8x512xf32>
    %c0_64 = arith.constant 0 : index
    %c0_65 = arith.constant 0 : index
    %134 = vector.load %arg5[%c0_64, %c0_65] : memref<8x1xf32, #tpu.memory_space<vmem>>, vector<8x1xf32>
    %135 = vector.broadcast %134 : vector<8x1xf32> to vector<8x512xf32>
    %136 = arith.addf %133, %135 : vector<8x512xf32>
    %cst_66 = arith.constant 0.000000e+00 : f32
    %137 = vector.broadcast %cst_66 : f32 to vector<8x512xf32>
    %138 = arith.maximumf %136, %137 : vector<8x512xf32>
    %139 = vector.extract_strided_slice %138 {offsets = [0, 0], sizes = [8, 256], strides = [1, 1]} : vector<8x512xf32> to vector<8x256xf32>
    %140 = arith.truncf %139 : vector<8x256xf32> to vector<8x256xbf16>
    %c0_67 = arith.constant 0 : index
    %c0_68 = arith.constant 0 : index
    %c0_69 = arith.constant 0 : index
    %141 = vector.load %arg6[%c0_67, %c0_68, %c0_69] : memref<2x8x256xbf16, #tpu.memory_space<vmem>>, vector<1x8x256xbf16>
    %142 = vector.shape_cast %141 : vector<1x8x256xbf16> to vector<8x256xbf16>
    %143 = vector.shape_cast %140 : vector<8x256xbf16> to vector<1x8x256xbf16>
    tpu.vector_store %arg6[%c0_67, %c0_68, %c0_69], %143 {strides = array<i32>} : memref<2x8x256xbf16, #tpu.memory_space<vmem>>, vector<1x8x256xbf16>,
    %144 = vector.extract_strided_slice %138 {offsets = [0, 256], sizes = [8, 256], strides = [1, 1]} : vector<8x512xf32> to vector<8x256xf32>
    %145 = arith.truncf %144 : vector<8x256xf32> to vector<8x256xbf16>
    %c1_70 = arith.constant 1 : index
    %c0_71 = arith.constant 0 : index
    %c0_72 = arith.constant 0 : index
    %146 = vector.load %arg6[%c1_70, %c0_71, %c0_72] : memref<2x8x256xbf16, #tpu.memory_space<vmem>>, vector<1x8x256xbf16>
    %147 = vector.shape_cast %146 : vector<1x8x256xbf16> to vector<8x256xbf16>
    %148 = vector.shape_cast %145 : vector<8x256xbf16> to vector<1x8x256xbf16>
    tpu.vector_store %arg6[%c1_70, %c0_71, %c0_72], %148 {strides = array<i32>} : memref<2x8x256xbf16, #tpu.memory_space<vmem>>, vector<1x8x256xbf16>,
    %cst_73 = arith.constant dense<0.000000e+00> : vector<8xf32>
    %149 = vector.multi_reduction <add>, %138, %cst_73 [1] : vector<8x512xf32> to vector<8xf32>
    %150 = vector.shape_cast %149 : vector<8xf32> to vector<8x1xf32>
    %c0_74 = arith.constant 0 : index
    %c0_75 = arith.constant 0 : index
    %c0_76 = arith.constant 0 : index
    %151 = vector.load %arg7[%c0_74, %c0_75, %c0_76] : memref<1x8x1xf32, #tpu.memory_space<vmem>>, vector<1x8x1xf32>
    %152 = vector.shape_cast %151 : vector<1x8x1xf32> to vector<8x1xf32>
    %153 = vector.shape_cast %150 : vector<8x1xf32> to vector<1x8x1xf32>
    tpu.vector_store %arg7[%c0_74, %c0_75, %c0_76], %153 {strides = array<i32>} : memref<1x8x1xf32, #tpu.memory_space<vmem>>, vector<1x8x1xf32>,
    %154 = arith.mulf %138, %138 : vector<8x512xf32>
    %cst_77 = arith.constant dense<0.000000e+00> : vector<8xf32>
    %155 = vector.multi_reduction <add>, %154, %cst_77 [1] : vector<8x512xf32> to vector<8xf32>
    %156 = vector.shape_cast %155 : vector<8xf32> to vector<8x1xf32>
    %c0_78 = arith.constant 0 : index
    %c0_79 = arith.constant 0 : index
    %c0_80 = arith.constant 0 : index
    %157 = vector.load %arg8[%c0_78, %c0_79, %c0_80] : memref<1x8x1xf32, #tpu.memory_space<vmem>>, vector<1x8x1xf32>
    %158 = vector.shape_cast %157 : vector<1x8x1xf32> to vector<8x1xf32>
    %159 = vector.shape_cast %156 : vector<8x1xf32> to vector<1x8x1xf32>
    tpu.vector_store %arg8[%c0_78, %c0_79, %c0_80], %159 {strides = array<i32>} : memref<1x8x1xf32, #tpu.memory_space<vmem>>, vector<1x8x1xf32>,
    return
  }
  func.func @transform_0(%arg0: i32) -> (i32, i32, i32) {
    %c0_i32 = arith.constant 0 : i32
    %c0_i32_0 = arith.constant 0 : i32
    %c0_i32_1 = arith.constant 0 : i32
    return %arg0, %c0_i32, %c0_i32_0 : i32, i32, i32
  }
  func.func @transform_1(%arg0: i32) -> (i32, i32) {
    %c0_i32 = arith.constant 0 : i32
    %c0_i32_0 = arith.constant 0 : i32
    %c0_i32_1 = arith.constant 0 : i32
    return %c0_i32, %c0_i32_0 : i32, i32
  }
  func.func @transform_2(%arg0: i32) -> (i32, i32) {
    %c0_i32 = arith.constant 0 : i32
    %c0_i32_0 = arith.constant 0 : i32
    %c0_i32_1 = arith.constant 0 : i32
    return %c0_i32, %c0_i32_0 : i32, i32
  }
  func.func @transform_3(%arg0: i32) -> (i32, i32) {
    %c0_i32 = arith.constant 0 : i32
    %c0_i32_0 = arith.constant 0 : i32
    %c0_i32_1 = arith.constant 0 : i32
    return %c0_i32, %c0_i32_0 : i32, i32
  }
  func.func @transform_4(%arg0: i32) -> (i32, i32) {
    %c0_i32 = arith.constant 0 : i32
    %c0_i32_0 = arith.constant 0 : i32
    %c0_i32_1 = arith.constant 0 : i32
    return %c0_i32, %c0_i32_0 : i32, i32
  }
  func.func @transform_5(%arg0: i32) -> (i32, i32, i32) {
    %c0_i32 = arith.constant 0 : i32
    %c0_i32_0 = arith.constant 0 : i32
    %c0_i32_1 = arith.constant 0 : i32
    return %arg0, %c0_i32, %c0_i32_0 : i32, i32, i32
  }
  func.func @transform_6(%arg0: i32) -> (i32, i32, i32) {
    %c0_i32 = arith.constant 0 : i32
    %c0_i32_0 = arith.constant 0 : i32
    %c0_i32_1 = arith.constant 0 : i32
    return %arg0, %c0_i32, %c0_i32_0 : i32, i32, i32
  }
  func.func @transform_7(%arg0: i32) -> (i32, i32, i32) {
    %c0_i32 = arith.constant 0 : i32
    %c0_i32_0 = arith.constant 0 : i32
    %c0_i32_1 = arith.constant 0 : i32
    return %arg0, %c0_i32, %c0_i32_0 : i32, i32, i32
  }
}

module attributes {stable_mosaic.version = 11 : i64} {
  func.func @kernel(%arg0: i32, %arg1: memref<2x8x256xbf16, #tpu.memory_space<vmem>>, %arg2: memref<8x1xf32, #tpu.memory_space<vmem>>, %arg3: memref<8x1xf32, #tpu.memory_space<vmem>>, %arg4: memref<8x72xbf16, #tpu.memory_space<vmem>>, %arg5: memref<8x1xf32, #tpu.memory_space<vmem>>, %arg6: memref<2x8x256xbf16, #tpu.memory_space<vmem>>, %arg7: memref<1x8x1xf32, #tpu.memory_space<vmem>>, %arg8: memref<1x8x1xf32, #tpu.memory_space<vmem>>, %arg9: memref<8x401xf32, #tpu.memory_space<vmem>>, %arg10: memref<72x512xbf16, #tpu.memory_space<vmem>>) attributes {dimension_semantics = [#tpu.dimension_semantics<parallel>], iteration_bounds = array<i64: 1>, scalar_prefetch = 0 : i64, scratch_operands = 2 : i64, tpu.core_type = #tpu.core_type<tc>, window_params = [{transform_indices = @transform_0, window_bounds = array<i64: 2, 8, 256>}, {pipeline_mode = #tpu.pipeline_mode<synchronous>, transform_indices = @transform_1, window_bounds = array<i64: 8, 1>}, {pipeline_mode = #tpu.pipeline_mode<synchronous>, transform_indices = @transform_2, window_bounds = array<i64: 8, 1>}, {pipeline_mode = #tpu.pipeline_mode<synchronous>, transform_indices = @transform_3, window_bounds = array<i64: 8, 72>}, {pipeline_mode = #tpu.pipeline_mode<synchronous>, transform_indices = @transform_4, window_bounds = array<i64: 8, 1>}, {transform_indices = @transform_5, window_bounds = array<i64: 2, 8, 256>}, {transform_indices = @transform_6, window_bounds = array<i64: 1, 8, 1>}, {transform_indices = @transform_7, window_bounds = array<i64: 1, 8, 1>}]} {
    %cst = arith.constant 0.000000e+00 : f32
    %0 = vector.broadcast %cst : f32 to vector<8x128xf32>
    %c0 = arith.constant 0 : index
    %c0_0 = arith.constant 0 : index
    %1 = vector.load %arg9[%c0, %c0_0] : memref<8x401xf32, #tpu.memory_space<vmem>>, vector<8x128xf32>
    tpu.vector_store %arg9[%c0, %c0_0], %0 {strides = array<i32>} : memref<8x401xf32, #tpu.memory_space<vmem>>, vector<8x128xf32>,
    %cst_1 = arith.constant 0.000000e+00 : f32
    %2 = vector.broadcast %cst_1 : f32 to vector<8x17xf32>
    %c0_2 = arith.constant 0 : index
    %c384 = arith.constant 384 : index
    %3 = vector.load %arg9[%c0_2, %c384] : memref<8x401xf32, #tpu.memory_space<vmem>>, vector<8x17xf32>
    tpu.vector_store %arg9[%c0_2, %c384], %2 {strides = array<i32>} : memref<8x401xf32, #tpu.memory_space<vmem>>, vector<8x17xf32>,
    %4 = tpu.iota {dimensions = array<i32: 1>} : vector<1x256xi32>
    %c15_i32 = arith.constant 15 : i32
    %5 = vector.broadcast %c15_i32 : i32 to vector<1x256xi32>
    %6 = arith.andi %4, %5 : vector<1x256xi32>
    %c0_i32 = arith.constant 0 : i32
    %7 = vector.broadcast %c0_i32 : i32 to vector<1x256xi32>
    %8 = arith.cmpi sgt, %6, %7 : vector<1x256xi32>
    %c15_i32_3 = arith.constant 15 : i32
    %9 = vector.broadcast %c15_i32_3 : i32 to vector<1x256xi32>
    %10 = arith.cmpi slt, %6, %9 : vector<1x256xi32>
    %c0_4 = arith.constant 0 : index
    %c0_5 = arith.constant 0 : index
    %11 = vector.load %arg2[%c0_4, %c0_5] : memref<8x1xf32, #tpu.memory_space<vmem>>, vector<8x1xf32>
    %c0_6 = arith.constant 0 : index
    %c0_7 = arith.constant 0 : index
    %12 = vector.load %arg3[%c0_6, %c0_7] : memref<8x1xf32, #tpu.memory_space<vmem>>, vector<8x1xf32>
    %c0_8 = arith.constant 0 : index
    %c0_9 = arith.constant 0 : index
    %c0_10 = arith.constant 0 : index
    %13 = vector.load %arg1[%c0_8, %c0_9, %c0_10] : memref<2x8x256xbf16, #tpu.memory_space<vmem>>, vector<1x8x256xbf16>
    %14 = vector.shape_cast %13 : vector<1x8x256xbf16> to vector<8x256xbf16>
    %15 = arith.extf %14 : vector<8x256xbf16> to vector<8x256xf32>
    %16 = vector.broadcast %11 : vector<8x1xf32> to vector<8x256xf32>
    %17 = arith.mulf %15, %16 : vector<8x256xf32>
    %18 = vector.broadcast %12 : vector<8x1xf32> to vector<8x256xf32>
    %19 = arith.addf %17, %18 : vector<8x256xf32>
    %c0_11 = arith.constant 0 : index
    %c128 = arith.constant 128 : index
    %20 = vector.load %arg9[%c0_11, %c128] : memref<8x401xf32, #tpu.memory_space<vmem>>, vector<8x256xf32>
    tpu.vector_store %arg9[%c0_11, %c128], %19 {strides = array<i32>} : memref<8x401xf32, #tpu.memory_space<vmem>>, vector<8x256xf32>,
    %c0_12 = arith.constant 0 : index
    %c0_13 = arith.constant 0 : index
    %21 = vector.load %arg9[%c0_12, %c0_13] : memref<8x401xf32, #tpu.memory_space<vmem>>, vector<8x401xf32>
    %22 = vector.extract_strided_slice %21 {offsets = [0, 111], sizes = [8, 256], strides = [1, 1]} : vector<8x401xf32> to vector<8x256xf32>
    %cst_14 = arith.constant 0.000000e+00 : f32
    %23 = vector.shape_cast %8 : vector<1x256xi1> to vector<1x256xi1>
    %24 = vector.broadcast %23 : vector<1x256xi1> to vector<8x256xi1>
    %25 = vector.broadcast %cst_14 : f32 to vector<8x256xf32>
    %26 = arith.select %24, %22, %25 : vector<8x256xi1>, vector<8x256xf32>
    %27 = arith.truncf %26 : vector<8x256xf32> to vector<8x256xbf16>
    %c0_15 = arith.constant 0 : index
    %c0_16 = arith.constant 0 : index
    %28 = vector.load %arg10[%c0_15, %c0_16] : memref<72x512xbf16, #tpu.memory_space<vmem>>, vector<8x256xbf16>
    tpu.vector_store %arg10[%c0_15, %c0_16], %27 {strides = array<i32>} : memref<72x512xbf16, #tpu.memory_space<vmem>>, vector<8x256xbf16>,
    %29 = vector.extract_strided_slice %21 {offsets = [0, 112], sizes = [8, 256], strides = [1, 1]} : vector<8x401xf32> to vector<8x256xf32>
    %30 = arith.truncf %29 : vector<8x256xf32> to vector<8x256xbf16>
    %c8 = arith.constant 8 : index
    %c0_17 = arith.constant 0 : index
    %31 = vector.load %arg10[%c8, %c0_17] : memref<72x512xbf16, #tpu.memory_space<vmem>>, vector<8x256xbf16>
    tpu.vector_store %arg10[%c8, %c0_17], %30 {strides = array<i32>} : memref<72x512xbf16, #tpu.memory_space<vmem>>, vector<8x256xbf16>,
    %32 = vector.extract_strided_slice %21 {offsets = [0, 113], sizes = [8, 256], strides = [1, 1]} : vector<8x401xf32> to vector<8x256xf32>
    %cst_18 = arith.constant 0.000000e+00 : f32
    %33 = vector.shape_cast %10 : vector<1x256xi1> to vector<1x256xi1>
    %34 = vector.broadcast %33 : vector<1x256xi1> to vector<8x256xi1>
    %35 = vector.broadcast %cst_18 : f32 to vector<8x256xf32>
    %36 = arith.select %34, %32, %35 : vector<8x256xi1>, vector<8x256xf32>
    %37 = arith.truncf %36 : vector<8x256xf32> to vector<8x256xbf16>
    %c16 = arith.constant 16 : index
    %c0_19 = arith.constant 0 : index
    %38 = vector.load %arg10[%c16, %c0_19] : memref<72x512xbf16, #tpu.memory_space<vmem>>, vector<8x256xbf16>
    tpu.vector_store %arg10[%c16, %c0_19], %37 {strides = array<i32>} : memref<72x512xbf16, #tpu.memory_space<vmem>>, vector<8x256xbf16>,
    %39 = vector.extract_strided_slice %21 {offsets = [0, 127], sizes = [8, 256], strides = [1, 1]} : vector<8x401xf32> to vector<8x256xf32>
    %cst_20 = arith.constant 0.000000e+00 : f32
    %40 = vector.shape_cast %8 : vector<1x256xi1> to vector<1x256xi1>
    %41 = vector.broadcast %40 : vector<1x256xi1> to vector<8x256xi1>
    %42 = vector.broadcast %cst_20 : f32 to vector<8x256xf32>
    %43 = arith.select %41, %39, %42 : vector<8x256xi1>, vector<8x256xf32>
    %44 = arith.truncf %43 : vector<8x256xf32> to vector<8x256xbf16>
    %c24 = arith.constant 24 : index
    %c0_21 = arith.constant 0 : index
    %45 = vector.load %arg10[%c24, %c0_21] : memref<72x512xbf16, #tpu.memory_space<vmem>>, vector<8x256xbf16>
    tpu.vector_store %arg10[%c24, %c0_21], %44 {strides = array<i32>} : memref<72x512xbf16, #tpu.memory_space<vmem>>, vector<8x256xbf16>,
    %46 = vector.extract_strided_slice %21 {offsets = [0, 128], sizes = [8, 256], strides = [1, 1]} : vector<8x401xf32> to vector<8x256xf32>
    %47 = arith.truncf %46 : vector<8x256xf32> to vector<8x256xbf16>
    %c32 = arith.constant 32 : index
    %c0_22 = arith.constant 0 : index
    %48 = vector.load %arg10[%c32, %c0_22] : memref<72x512xbf16, #tpu.memory_space<vmem>>, vector<8x256xbf16>
    tpu.vector_store %arg10[%c32, %c0_22], %47 {strides = array<i32>} : memref<72x512xbf16, #tpu.memory_space<vmem>>, vector<8x256xbf16>,
    %49 = vector.extract_strided_slice %21 {offsets = [0, 129], sizes = [8, 256], strides = [1, 1]} : vector<8x401xf32> to vector<8x256xf32>
    %cst_23 = arith.constant 0.000000e+00 : f32
    %50 = vector.shape_cast %10 : vector<1x256xi1> to vector<1x256xi1>
    %51 = vector.broadcast %50 : vector<1x256xi1> to vector<8x256xi1>
    %52 = vector.broadcast %cst_23 : f32 to vector<8x256xf32>
    %53 = arith.select %51, %49, %52 : vector<8x256xi1>, vector<8x256xf32>
    %54 = arith.truncf %53 : vector<8x256xf32> to vector<8x256xbf16>
    %c40 = arith.constant 40 : index
    %c0_24 = arith.constant 0 : index
    %55 = vector.load %arg10[%c40, %c0_24] : memref<72x512xbf16, #tpu.memory_space<vmem>>, vector<8x256xbf16>
    tpu.vector_store %arg10[%c40, %c0_24], %54 {strides = array<i32>} : memref<72x512xbf16, #tpu.memory_space<vmem>>, vector<8x256xbf16>,
    %56 = vector.extract_strided_slice %21 {offsets = [0, 143], sizes = [8, 256], strides = [1, 1]} : vector<8x401xf32> to vector<8x256xf32>
    %cst_25 = arith.constant 0.000000e+00 : f32
    %57 = vector.shape_cast %8 : vector<1x256xi1> to vector<1x256xi1>
    %58 = vector.broadcast %57 : vector<1x256xi1> to vector<8x256xi1>
    %59 = vector.broadcast %cst_25 : f32 to vector<8x256xf32>
    %60 = arith.select %58, %56, %59 : vector<8x256xi1>, vector<8x256xf32>
    %61 = arith.truncf %60 : vector<8x256xf32> to vector<8x256xbf16>
    %c48 = arith.constant 48 : index
    %c0_26 = arith.constant 0 : index
    %62 = vector.load %arg10[%c48, %c0_26] : memref<72x512xbf16, #tpu.memory_space<vmem>>, vector<8x256xbf16>
    tpu.vector_store %arg10[%c48, %c0_26], %61 {strides = array<i32>} : memref<72x512xbf16, #tpu.memory_space<vmem>>, vector<8x256xbf16>,
    %63 = vector.extract_strided_slice %21 {offsets = [0, 144], sizes = [8, 256], strides = [1, 1]} : vector<8x401xf32> to vector<8x256xf32>
    %64 = arith.truncf %63 : vector<8x256xf32> to vector<8x256xbf16>
    %c56 = arith.constant 56 : index
    %c0_27 = arith.constant 0 : index
    %65 = vector.load %arg10[%c56, %c0_27] : memref<72x512xbf16, #tpu.memory_space<vmem>>, vector<8x256xbf16>
    tpu.vector_store %arg10[%c56, %c0_27], %64 {strides = array<i32>} : memref<72x512xbf16, #tpu.memory_space<vmem>>, vector<8x256xbf16>,
    %66 = vector.extract_strided_slice %21 {offsets = [0, 145], sizes = [8, 256], strides = [1, 1]} : vector<8x401xf32> to vector<8x256xf32>
    %cst_28 = arith.constant 0.000000e+00 : f32
    %67 = vector.shape_cast %10 : vector<1x256xi1> to vector<1x256xi1>
    %68 = vector.broadcast %67 : vector<1x256xi1> to vector<8x256xi1>
    %69 = vector.broadcast %cst_28 : f32 to vector<8x256xf32>
    %70 = arith.select %68, %66, %69 : vector<8x256xi1>, vector<8x256xf32>
    %71 = arith.truncf %70 : vector<8x256xf32> to vector<8x256xbf16>
    %c64 = arith.constant 64 : index
    %c0_29 = arith.constant 0 : index
    %72 = vector.load %arg10[%c64, %c0_29] : memref<72x512xbf16, #tpu.memory_space<vmem>>, vector<8x256xbf16>
    tpu.vector_store %arg10[%c64, %c0_29], %71 {strides = array<i32>} : memref<72x512xbf16, #tpu.memory_space<vmem>>, vector<8x256xbf16>,
    %c1 = arith.constant 1 : index
    %c0_30 = arith.constant 0 : index
    %c0_31 = arith.constant 0 : index
    %73 = vector.load %arg1[%c1, %c0_30, %c0_31] : memref<2x8x256xbf16, #tpu.memory_space<vmem>>, vector<1x8x256xbf16>
    %74 = vector.shape_cast %73 : vector<1x8x256xbf16> to vector<8x256xbf16>
    %75 = arith.extf %74 : vector<8x256xbf16> to vector<8x256xf32>
    %76 = vector.broadcast %11 : vector<8x1xf32> to vector<8x256xf32>
    %77 = arith.mulf %75, %76 : vector<8x256xf32>
    %78 = vector.broadcast %12 : vector<8x1xf32> to vector<8x256xf32>
    %79 = arith.addf %77, %78 : vector<8x256xf32>
    %c0_32 = arith.constant 0 : index
    %c128_33 = arith.constant 128 : index
    %80 = vector.load %arg9[%c0_32, %c128_33] : memref<8x401xf32, #tpu.memory_space<vmem>>, vector<8x256xf32>
    tpu.vector_store %arg9[%c0_32, %c128_33], %79 {strides = array<i32>} : memref<8x401xf32, #tpu.memory_space<vmem>>, vector<8x256xf32>,
    %c0_34 = arith.constant 0 : index
    %c0_35 = arith.constant 0 : index
    %81 = vector.load %arg9[%c0_34, %c0_35] : memref<8x401xf32, #tpu.memory_space<vmem>>, vector<8x401xf32>
    %82 = vector.extract_strided_slice %81 {offsets = [0, 111], sizes = [8, 256], strides = [1, 1]} : vector<8x401xf32> to vector<8x256xf32>
    %cst_36 = arith.constant 0.000000e+00 : f32
    %83 = vector.shape_cast %8 : vector<1x256xi1> to vector<1x256xi1>
    %84 = vector.broadcast %83 : vector<1x256xi1> to vector<8x256xi1>
    %85 = vector.broadcast %cst_36 : f32 to vector<8x256xf32>
    %86 = arith.select %84, %82, %85 : vector<8x256xi1>, vector<8x256xf32>
    %87 = arith.truncf %86 : vector<8x256xf32> to vector<8x256xbf16>
    %c0_37 = arith.constant 0 : index
    %c256 = arith.constant 256 : index
    %88 = vector.load %arg10[%c0_37, %c256] : memref<72x512xbf16, #tpu.memory_space<vmem>>, vector<8x256xbf16>
    tpu.vector_store %arg10[%c0_37, %c256], %87 {strides = array<i32>} : memref<72x512xbf16, #tpu.memory_space<vmem>>, vector<8x256xbf16>,
    %89 = vector.extract_strided_slice %81 {offsets = [0, 112], sizes = [8, 256], strides = [1, 1]} : vector<8x401xf32> to vector<8x256xf32>
    %90 = arith.truncf %89 : vector<8x256xf32> to vector<8x256xbf16>
    %c8_38 = arith.constant 8 : index
    %c256_39 = arith.constant 256 : index
    %91 = vector.load %arg10[%c8_38, %c256_39] : memref<72x512xbf16, #tpu.memory_space<vmem>>, vector<8x256xbf16>
    tpu.vector_store %arg10[%c8_38, %c256_39], %90 {strides = array<i32>} : memref<72x512xbf16, #tpu.memory_space<vmem>>, vector<8x256xbf16>,
    %92 = vector.extract_strided_slice %81 {offsets = [0, 113], sizes = [8, 256], strides = [1, 1]} : vector<8x401xf32> to vector<8x256xf32>
    %cst_40 = arith.constant 0.000000e+00 : f32
    %93 = vector.shape_cast %10 : vector<1x256xi1> to vector<1x256xi1>
    %94 = vector.broadcast %93 : vector<1x256xi1> to vector<8x256xi1>
    %95 = vector.broadcast %cst_40 : f32 to vector<8x256xf32>
    %96 = arith.select %94, %92, %95 : vector<8x256xi1>, vector<8x256xf32>
    %97 = arith.truncf %96 : vector<8x256xf32> to vector<8x256xbf16>
    %c16_41 = arith.constant 16 : index
    %c256_42 = arith.constant 256 : index
    %98 = vector.load %arg10[%c16_41, %c256_42] : memref<72x512xbf16, #tpu.memory_space<vmem>>, vector<8x256xbf16>
    tpu.vector_store %arg10[%c16_41, %c256_42], %97 {strides = array<i32>} : memref<72x512xbf16, #tpu.memory_space<vmem>>, vector<8x256xbf16>,
    %99 = vector.extract_strided_slice %81 {offsets = [0, 127], sizes = [8, 256], strides = [1, 1]} : vector<8x401xf32> to vector<8x256xf32>
    %cst_43 = arith.constant 0.000000e+00 : f32
    %100 = vector.shape_cast %8 : vector<1x256xi1> to vector<1x256xi1>
    %101 = vector.broadcast %100 : vector<1x256xi1> to vector<8x256xi1>
    %102 = vector.broadcast %cst_43 : f32 to vector<8x256xf32>
    %103 = arith.select %101, %99, %102 : vector<8x256xi1>, vector<8x256xf32>
    %104 = arith.truncf %103 : vector<8x256xf32> to vector<8x256xbf16>
    %c24_44 = arith.constant 24 : index
    %c256_45 = arith.constant 256 : index
    %105 = vector.load %arg10[%c24_44, %c256_45] : memref<72x512xbf16, #tpu.memory_space<vmem>>, vector<8x256xbf16>
    tpu.vector_store %arg10[%c24_44, %c256_45], %104 {strides = array<i32>} : memref<72x512xbf16, #tpu.memory_space<vmem>>, vector<8x256xbf16>,
    %106 = vector.extract_strided_slice %81 {offsets = [0, 128], sizes = [8, 256], strides = [1, 1]} : vector<8x401xf32> to vector<8x256xf32>
    %107 = arith.truncf %106 : vector<8x256xf32> to vector<8x256xbf16>
    %c32_46 = arith.constant 32 : index
    %c256_47 = arith.constant 256 : index
    %108 = vector.load %arg10[%c32_46, %c256_47] : memref<72x512xbf16, #tpu.memory_space<vmem>>, vector<8x256xbf16>
    tpu.vector_store %arg10[%c32_46, %c256_47], %107 {strides = array<i32>} : memref<72x512xbf16, #tpu.memory_space<vmem>>, vector<8x256xbf16>,
    %109 = vector.extract_strided_slice %81 {offsets = [0, 129], sizes = [8, 256], strides = [1, 1]} : vector<8x401xf32> to vector<8x256xf32>
    %cst_48 = arith.constant 0.000000e+00 : f32
    %110 = vector.shape_cast %10 : vector<1x256xi1> to vector<1x256xi1>
    %111 = vector.broadcast %110 : vector<1x256xi1> to vector<8x256xi1>
    %112 = vector.broadcast %cst_48 : f32 to vector<8x256xf32>
    %113 = arith.select %111, %109, %112 : vector<8x256xi1>, vector<8x256xf32>
    %114 = arith.truncf %113 : vector<8x256xf32> to vector<8x256xbf16>
    %c40_49 = arith.constant 40 : index
    %c256_50 = arith.constant 256 : index
    %115 = vector.load %arg10[%c40_49, %c256_50] : memref<72x512xbf16, #tpu.memory_space<vmem>>, vector<8x256xbf16>
    tpu.vector_store %arg10[%c40_49, %c256_50], %114 {strides = array<i32>} : memref<72x512xbf16, #tpu.memory_space<vmem>>, vector<8x256xbf16>,
    %116 = vector.extract_strided_slice %81 {offsets = [0, 143], sizes = [8, 256], strides = [1, 1]} : vector<8x401xf32> to vector<8x256xf32>
    %cst_51 = arith.constant 0.000000e+00 : f32
    %117 = vector.shape_cast %8 : vector<1x256xi1> to vector<1x256xi1>
    %118 = vector.broadcast %117 : vector<1x256xi1> to vector<8x256xi1>
    %119 = vector.broadcast %cst_51 : f32 to vector<8x256xf32>
    %120 = arith.select %118, %116, %119 : vector<8x256xi1>, vector<8x256xf32>
    %121 = arith.truncf %120 : vector<8x256xf32> to vector<8x256xbf16>
    %c48_52 = arith.constant 48 : index
    %c256_53 = arith.constant 256 : index
    %122 = vector.load %arg10[%c48_52, %c256_53] : memref<72x512xbf16, #tpu.memory_space<vmem>>, vector<8x256xbf16>
    tpu.vector_store %arg10[%c48_52, %c256_53], %121 {strides = array<i32>} : memref<72x512xbf16, #tpu.memory_space<vmem>>, vector<8x256xbf16>,
    %123 = vector.extract_strided_slice %81 {offsets = [0, 144], sizes = [8, 256], strides = [1, 1]} : vector<8x401xf32> to vector<8x256xf32>
    %124 = arith.truncf %123 : vector<8x256xf32> to vector<8x256xbf16>
    %c56_54 = arith.constant 56 : index
    %c256_55 = arith.constant 256 : index
    %125 = vector.load %arg10[%c56_54, %c256_55] : memref<72x512xbf16, #tpu.memory_space<vmem>>, vector<8x256xbf16>
    tpu.vector_store %arg10[%c56_54, %c256_55], %124 {strides = array<i32>} : memref<72x512xbf16, #tpu.memory_space<vmem>>, vector<8x256xbf16>,
    %126 = vector.extract_strided_slice %81 {offsets = [0, 145], sizes = [8, 256], strides = [1, 1]} : vector<8x401xf32> to vector<8x256xf32>
    %cst_56 = arith.constant 0.000000e+00 : f32
    %127 = vector.shape_cast %10 : vector<1x256xi1> to vector<1x256xi1>
    %128 = vector.broadcast %127 : vector<1x256xi1> to vector<8x256xi1>
    %129 = vector.broadcast %cst_56 : f32 to vector<8x256xf32>
    %130 = arith.select %128, %126, %129 : vector<8x256xi1>, vector<8x256xf32>
    %131 = arith.truncf %130 : vector<8x256xf32> to vector<8x256xbf16>
    %c64_57 = arith.constant 64 : index
    %c256_58 = arith.constant 256 : index
    %132 = vector.load %arg10[%c64_57, %c256_58] : memref<72x512xbf16, #tpu.memory_space<vmem>>, vector<8x256xbf16>
    tpu.vector_store %arg10[%c64_57, %c256_58], %131 {strides = array<i32>} : memref<72x512xbf16, #tpu.memory_space<vmem>>, vector<8x256xbf16>,
    %c0_59 = arith.constant 0 : index
    %c0_60 = arith.constant 0 : index
    %133 = vector.load %arg4[%c0_59, %c0_60] : memref<8x72xbf16, #tpu.memory_space<vmem>>, vector<8x72xbf16>
    %c0_61 = arith.constant 0 : index
    %c0_62 = arith.constant 0 : index
    %134 = vector.load %arg10[%c0_61, %c0_62] : memref<72x512xbf16, #tpu.memory_space<vmem>>, vector<72x512xbf16>
    %cst_63 = arith.constant dense<0.000000e+00> : vector<8x512xf32>
    %135 = tpu.matmul %133, %134, %cst_63 {dimension_numbers = #tpu.dot_dimension_numbers<[1], [0], [0], [1], [0, 0, 1, 1], [], []>} : vector<8x72xbf16>, vector<72x512xbf16>, vector<8x512xf32> -> vector<8x512xf32>
    %c0_64 = arith.constant 0 : index
    %c0_65 = arith.constant 0 : index
    %136 = vector.load %arg5[%c0_64, %c0_65] : memref<8x1xf32, #tpu.memory_space<vmem>>, vector<8x1xf32>
    %137 = vector.broadcast %136 : vector<8x1xf32> to vector<8x512xf32>
    %138 = arith.addf %135, %137 : vector<8x512xf32>
    %cst_66 = arith.constant 0.000000e+00 : f32
    %139 = vector.broadcast %cst_66 : f32 to vector<8x512xf32>
    %140 = arith.maximumf %138, %139 : vector<8x512xf32>
    %141 = vector.extract_strided_slice %140 {offsets = [0, 0], sizes = [8, 256], strides = [1, 1]} : vector<8x512xf32> to vector<8x256xf32>
    %142 = arith.truncf %141 : vector<8x256xf32> to vector<8x256xbf16>
    %c0_67 = arith.constant 0 : index
    %c0_68 = arith.constant 0 : index
    %c0_69 = arith.constant 0 : index
    %143 = vector.load %arg6[%c0_67, %c0_68, %c0_69] : memref<2x8x256xbf16, #tpu.memory_space<vmem>>, vector<1x8x256xbf16>
    %144 = vector.shape_cast %143 : vector<1x8x256xbf16> to vector<8x256xbf16>
    %145 = vector.shape_cast %142 : vector<8x256xbf16> to vector<1x8x256xbf16>
    tpu.vector_store %arg6[%c0_67, %c0_68, %c0_69], %145 {strides = array<i32>} : memref<2x8x256xbf16, #tpu.memory_space<vmem>>, vector<1x8x256xbf16>,
    %146 = vector.extract_strided_slice %140 {offsets = [0, 256], sizes = [8, 256], strides = [1, 1]} : vector<8x512xf32> to vector<8x256xf32>
    %147 = arith.truncf %146 : vector<8x256xf32> to vector<8x256xbf16>
    %c1_70 = arith.constant 1 : index
    %c0_71 = arith.constant 0 : index
    %c0_72 = arith.constant 0 : index
    %148 = vector.load %arg6[%c1_70, %c0_71, %c0_72] : memref<2x8x256xbf16, #tpu.memory_space<vmem>>, vector<1x8x256xbf16>
    %149 = vector.shape_cast %148 : vector<1x8x256xbf16> to vector<8x256xbf16>
    %150 = vector.shape_cast %147 : vector<8x256xbf16> to vector<1x8x256xbf16>
    tpu.vector_store %arg6[%c1_70, %c0_71, %c0_72], %150 {strides = array<i32>} : memref<2x8x256xbf16, #tpu.memory_space<vmem>>, vector<1x8x256xbf16>,
    %cst_73 = arith.constant dense<0.000000e+00> : vector<8xf32>
    %151 = vector.multi_reduction <add>, %140, %cst_73 [1] : vector<8x512xf32> to vector<8xf32>
    %152 = vector.shape_cast %151 : vector<8xf32> to vector<8x1xf32>
    %c0_74 = arith.constant 0 : index
    %c0_75 = arith.constant 0 : index
    %c0_76 = arith.constant 0 : index
    %153 = vector.load %arg7[%c0_74, %c0_75, %c0_76] : memref<1x8x1xf32, #tpu.memory_space<vmem>>, vector<1x8x1xf32>
    %154 = vector.shape_cast %153 : vector<1x8x1xf32> to vector<8x1xf32>
    %155 = vector.shape_cast %152 : vector<8x1xf32> to vector<1x8x1xf32>
    tpu.vector_store %arg7[%c0_74, %c0_75, %c0_76], %155 {strides = array<i32>} : memref<1x8x1xf32, #tpu.memory_space<vmem>>, vector<1x8x1xf32>,
    %156 = arith.mulf %140, %140 : vector<8x512xf32>
    %cst_77 = arith.constant dense<0.000000e+00> : vector<8xf32>
    %157 = vector.multi_reduction <add>, %156, %cst_77 [1] : vector<8x512xf32> to vector<8xf32>
    %158 = vector.shape_cast %157 : vector<8xf32> to vector<8x1xf32>
    %c0_78 = arith.constant 0 : index
    %c0_79 = arith.constant 0 : index
    %c0_80 = arith.constant 0 : index
    %159 = vector.load %arg8[%c0_78, %c0_79, %c0_80] : memref<1x8x1xf32, #tpu.memory_space<vmem>>, vector<1x8x1xf32>
    %160 = vector.shape_cast %159 : vector<1x8x1xf32> to vector<8x1xf32>
    %161 = vector.shape_cast %158 : vector<8x1xf32> to vector<1x8x1xf32>
    tpu.vector_store %arg8[%c0_78, %c0_79, %c0_80], %161 {strides = array<i32>} : memref<1x8x1xf32, #tpu.memory_space<vmem>>, vector<1x8x1xf32>,
    return
  }
  func.func @transform_0(%arg0: i32) -> (i32, i32, i32) {
    %c0_i32 = arith.constant 0 : i32
    %c0_i32_0 = arith.constant 0 : i32
    %c0_i32_1 = arith.constant 0 : i32
    return %arg0, %c0_i32, %c0_i32_0 : i32, i32, i32
  }
  func.func @transform_1(%arg0: i32) -> (i32, i32) {
    %c0_i32 = arith.constant 0 : i32
    %c0_i32_0 = arith.constant 0 : i32
    %c0_i32_1 = arith.constant 0 : i32
    return %c0_i32, %c0_i32_0 : i32, i32
  }
  func.func @transform_2(%arg0: i32) -> (i32, i32) {
    %c0_i32 = arith.constant 0 : i32
    %c0_i32_0 = arith.constant 0 : i32
    %c0_i32_1 = arith.constant 0 : i32
    return %c0_i32, %c0_i32_0 : i32, i32
  }
  func.func @transform_3(%arg0: i32) -> (i32, i32) {
    %c0_i32 = arith.constant 0 : i32
    %c0_i32_0 = arith.constant 0 : i32
    %c0_i32_1 = arith.constant 0 : i32
    return %c0_i32, %c0_i32_0 : i32, i32
  }
  func.func @transform_4(%arg0: i32) -> (i32, i32) {
    %c0_i32 = arith.constant 0 : i32
    %c0_i32_0 = arith.constant 0 : i32
    %c0_i32_1 = arith.constant 0 : i32
    return %c0_i32, %c0_i32_0 : i32, i32
  }
  func.func @transform_5(%arg0: i32) -> (i32, i32, i32) {
    %c0_i32 = arith.constant 0 : i32
    %c0_i32_0 = arith.constant 0 : i32
    %c0_i32_1 = arith.constant 0 : i32
    return %arg0, %c0_i32, %c0_i32_0 : i32, i32, i32
  }
  func.func @transform_6(%arg0: i32) -> (i32, i32, i32) {
    %c0_i32 = arith.constant 0 : i32
    %c0_i32_0 = arith.constant 0 : i32
    %c0_i32_1 = arith.constant 0 : i32
    return %arg0, %c0_i32, %c0_i32_0 : i32, i32, i32
  }
  func.func @transform_7(%arg0: i32) -> (i32, i32, i32) {
    %c0_i32 = arith.constant 0 : i32
    %c0_i32_0 = arith.constant 0 : i32
    %c0_i32_1 = arith.constant 0 : i32
    return %arg0, %c0_i32, %c0_i32_0 : i32, i32, i32
  }
}

</mosaic_0001>

<bundles_post_ra>
// kernel: double_conv_bn_relu.3
= control target key start
LH: loop header
LB: loop body
LE: loop exit
PB: predicated region body
PF: predicated region fallthrough
CT: control target
= control target key end

     0   :  { %vm25_vm0 = vcmask 138240   ;;  %v900_v0 = vmov 0   ;;  %v901_v2 = vmov 0.0   ;;  %s902_s28 = smov 112   ;;  %s905_s9 = smov 127   ;;  %v27_v43 = vlaneseq  ;;  %s1204_s1 = inlined_call_operand.vmem [shape: f32[8,1], index: 1, kind: input, shape index: {}]   ;;  %s1205_s2 = inlined_call_operand.vmem [shape: f32[8,1], index: 2, kind: input, shape index: {}]   ;;  %s1206_s0 = inlined_call_operand.vmem [shape: bf16[2,8,256], index: 0, kind: input, shape index: {}]   ;;  %s1207_s4 = inlined_call_operand.vmem [shape: f32[8,1], index: 4, kind: input, shape index: {}]   ;;  %s1208_s3 = inlined_call_operand.vmem [shape: bf16[8,72], index: 3, kind: input, shape index: {}]   ;;  %s1209_s5 = inlined_call_operand.vmem [shape: bf16[2,8,256], index: 5, kind: output, shape index: {0}]   ;;  %s1210_s6 = inlined_call_operand.vmem [shape: f32[1,8,1], index: 6, kind: output, shape index: {1}]   ;;  %s1211_s7 = inlined_call_operand.vmem [shape: f32[1,8,1], index: 7, kind: output, shape index: {2}]  }
   0x1   :  { %809 = vset.pattern.permute.xlu0 %v900_v0  ;;  %v36_v1 = vld [vmem:[%s1204_s1] sm:$0xff]  ;;  %26 = vst.msk [vmem:[#allocation2 + $0x18] sm:$0xff] %vm25_vm0, %v901_v2  ;;  %591 = vmatprep.mubr.bf16.mxu0 %v900_v0  ;;  %v702_v7 = vld [vmem:[%s1206_s0 + $0x8] sm:$0xff]  ;;  %s906_s10 = smov 1   ;;  %s907_s11 = smov 15   ;;  %vm229_vm1 = vcmask 908288  }
   0x2   :  { %43 = vperm.xlu0 %809, %v36_v1   ;;  %632 = vmatprep.mubr.bf16.mxu1 %v900_v0  ;;  %v37_v3 = vld [vmem:[%s1205_s2] sm:$0xff]  ;;  %v247_v10 = vunpack.c.l.bf16 %v702_v7  ;;  %v248_v11 = vunpack.c.h.bf16 %v702_v7  ;;  %s904_s2 = smov 111   ;;  %s908_s12 = smov 17   ;;  %v28_v46 = vand.u32 127, %v27_v43  ;;  %vm192_vm3 = vcmask 924672  }
   0x3   :  { %v38_v6 = vld [vmem:[%s1206_s0] sm:$0xff]  ;;  %s903_s0 = smov 113   ;;  %s909_s13 = smov 16   ;;  %vm170_vm4 = vcmask 1039360   ;;  %vm122_vm7 = vcmask 121856   ;;  %vm106_vm8 = vcmask 1043456  }
   0x4   :  { %v39_v8 = vunpack.c.l.bf16 %v38_v6  ;;  %v40_v9 = vunpack.c.h.bf16 %v38_v6  ;;  %v446_v38 = vld [vmem:[%s1207_s4] sm:$0xff]  ;;  %v30_v51 = vand.u32 15, %v28_v46  ;;  %v29_v52 = vadd.s32 128, %v28_v46 }
   0x5   :  { %vm219_vm9 = vcmask 916480   ;;  %vm144_vm11 = vcmask 7168   ;;  %vm108_vm12 = vcmask 130048   ;;  %vm910_vm13 = vmmov 1  }
   0x6   :  { %50 = vperm.xlu0 %809, %v37_v3   ;;  %vm1026_vm2 = vcmp.lt.s32.totalorder %v30_v51, 15  ;;  %v31_v59 = vand.u32 15, %v29_v52  ;;  %vm1039_vm6 = vcmp.gt.s32.totalorder %v30_v51, 0 }
   0x7   :  { %vm1110_vm15 = vmpackc.low %vm1026_vm2, %vm910_vm13 }
   0x8   :  { %v60_v4 = vld [vmem:[#allocation2 + $0x18] sm:$0xff]  ;;  %vm1033_vm5 = vcmp.lt.s32.totalorder %v31_v59, 15  ;;  %vm1048_vm10 = vcmp.gt.s32.totalorder %v31_v59, 0 }
   0x9   :  { %v748_v5 = vpack.c.bf16 %v60_v4, %v60_v4  ;;  %vm1082_vm14 = vmpackc.low %vm1033_vm5, %vm910_vm13 }
   0xb   :  { %214 = vrot.lane.b32.xlu1 %v748_v5, %s902_s28 }
   0xf   :  { %398 = vrot.lane.b32.xlu1 %v748_v5, %s902_s28 }
  0x7d   :  { %v44_v12 = vpop.permute.xlu0 %43  ;;  %v215_v39 = vpop.permute.xlu1 %214 }
  0x7e   :  { %v46_v13 = vmul.f32 %v44_v12, %v39_v8  ;;  %v47_v14 = vmul.f32 %v44_v12, %v40_v9  ;;  %v249_v15 = vmul.f32 %v247_v10, %v44_v12  ;;  %v250_v16 = vmul.f32 %v248_v11, %v44_v12 }
  0x7f   :  { %v217_v1 = vrot.slane %v215_v39, 4 }
  0x81   :  { %v51_v17 = vpop.permute.xlu0 %50  ;;  %v1012_v40 = vpop.permute.xlu1 %398 }
  0x82   :  { %v967_v18 = vadd.f32 %v51_v17, %v46_v13  ;;  %v969_v19 = vadd.f32 %v51_v17, %v47_v14  ;;  %v971_v20 = vadd.f32 %v249_v15, %v51_v17  ;;  %v973_v21 = vadd.f32 %v250_v16, %v51_v17 }
  0x83   :  { %v401_v5 = vrot.slane %v1012_v40, 4 }
  0x84   :  { %v815_v22 = vpack.i.bf16 %v969_v19, %v967_v18  ;;  %v820_v23 = vpack.i.bf16 %v60_v4, %v969_v19  ;;  %v835_v24 = vpack.i.bf16 %v967_v18, %v901_v2  ;;  %v840_v25 = vpack.i.bf16 %v901_v2, %v969_v19 }
  0x85   :  { %v741_v26 = vpack.c.bf16 %v967_v18, %v901_v2  ;;  %v745_v27 = vpack.c.bf16 %v969_v19, %v967_v18  ;;  %v845_v28 = vpack.i.bf16 %v971_v20, %v60_v4  ;;  %v742_v29 = vpack.c.bf16 %v969_v19, %v969_v19 }
  0x86   :  { %816 = vrot.lane.b32.xlu0 %v815_v22, %s903_s0  ;;  %811 = vrot.lane.b32.xlu1 %v815_v22, %s904_s2  ;;  %v855_v30 = vpack.i.bf16 %v60_v4, %v973_v21  ;;  %v865_v31 = vpack.i.bf16 %v973_v21, %v967_v18  ;;  %v755_v32 = vpack.c.bf16 %v973_v21, %v971_v20 }
  0x87   :  { %v875_v33 = vpack.i.bf16 %v971_v20, %v901_v2  ;;  %v885_v34 = vpack.i.bf16 %v901_v2, %v973_v21  ;;  %v895_v35 = vpack.i.bf16 %v973_v21, %v971_v20  ;;  %v751_v36 = vpack.c.bf16 %v971_v20, %v901_v2 }
  0x88   :  { %v752_v37 = vpack.c.bf16 %v973_v21, %v973_v21 }
  0x8a   :  { %821 = vrot.lane.b32.xlu0 %v820_v23, %s905_s9  ;;  %831 = vrot.lane.b32.xlu1 %v815_v22, %s906_s10 }
  0x8e   :  { %826 = vrot.lane.b32.xlu0 %v815_v22, %s907_s11  ;;  %836 = vrot.lane.b32.xlu1 %v835_v24, %s908_s12 }
  0x92   :  { %841 = vrot.lane.b32.xlu0 %v840_v25, %s908_s12  ;;  %100 = vrot.lane.b32.xlu1 %v741_v26, %s909_s13 }
  0x96   :  { %212 = vrot.lane.b32.xlu0 %v745_v27, %s902_s28  ;;  %846 = vrot.lane.b32.xlu1 %v845_v28, %s904_s2 }
  0x9a   :  { %102 = vrot.lane.b32.xlu0 %v742_v29, %s909_s13  ;;  %851 = vrot.lane.b32.xlu1 %v845_v28, %s903_s0 }
  0x9e   :  { %856 = vrot.lane.b32.xlu0 %v855_v30, %s904_s2  ;;  %861 = vrot.lane.b32.xlu1 %v855_v30, %s903_s0 }
  0xa2   :  { %871 = vrot.lane.b32.xlu0 %v845_v28, %s905_s9  ;;  %866 = vrot.lane.b32.xlu1 %v865_v31, %s905_s9 }
  0xa6   :  { %396 = vrot.lane.b32.xlu0 %v755_v32, %s902_s28  ;;  %876 = vrot.lane.b32.xlu1 %v875_v33, %s907_s11 }
  0xaa   :  { %881 = vrot.lane.b32.xlu0 %v875_v33, %s906_s10  ;;  %886 = vrot.lane.b32.xlu1 %v885_v34, %s907_s11 }
  0xae   :  { %891 = vrot.lane.b32.xlu0 %v885_v34, %s906_s10  ;;  %896 = vrot.lane.b32.xlu1 %v895_v35, %s908_s12 }
  0xb2   :  { %294 = vrot.lane.b32.xlu0 %v751_v36, %s909_s13  ;;  %296 = vrot.lane.b32.xlu1 %v752_v37, %s909_s13 }
  0xb6   :  { %449 = vperm.xlu0 %809, %v446_v38  }
  0xf8   :  { %v817_v41 = vpop.permute.xlu0 %816  ;;  %v812_v42 = vpop.permute.xlu1 %811 }
  0xf9   :  { %v814_v49 = vunpack.i.h.bf16 %v812_v42  ;;  %v813_v50 = vunpack.i.l.bf16 %v812_v42  ;;  %v819_v57 = vunpack.i.h.bf16 %v817_v41  ;;  %v818_v58 = vunpack.i.l.bf16 %v817_v41 }
  0xfb   :  { %v230_v56 = vsel %vm229_vm1, %v813_v50, %v814_v49  ;;  %v193_v6 = vsel %vm192_vm3, %v818_v58, %v819_v57 }
  0xfc   :  { %v1014_v44 = vpop.permute.xlu0 %821  ;;  %v1016_v45 = vpop.permute.xlu1 %831  ;;  %v234_v62 = vsel %vm1026_vm2, %v230_v56, 0.0  ;;  %v197_v23 = vsel %vm1039_vm6, %v193_v6, 0.0 }
  0xfd   :  { %v824_v2 = vunpack.i.h.bf16 %v1014_v44  ;;  %v823_v3 = vunpack.i.l.bf16 %v1014_v44  ;;  %v770_v8 = vpack.c.bf16 %v234_v62, %v234_v62  ;;  %v834_v17 = vunpack.i.h.bf16 %v1016_v45 }
  0xfe   :  { %v833_v22 = vunpack.i.l.bf16 %v1016_v45 }
  0xff   :  { %v172_v16 = vsel %vm170_vm4, %v823_v3, %v824_v2  ;;  %v548_v27 = vsel %vm106_vm8, %v770_v8, 0 }
 0x100   :  { %v1018_v47 = vpop.permute.xlu0 %826  ;;  %v1020_v48 = vpop.permute.xlu1 %836  ;;  %v775_v59 = vpack.c.bf16 %v172_v16, %v969_v19 }
 0x101   :  { %v829_v24 = vunpack.i.h.bf16 %v1018_v47  ;;  %v828_v25 = vunpack.i.l.bf16 %v1018_v47  ;;  %v839_v28 = vunpack.i.h.bf16 %v1020_v48  ;;  %v838_v38 = vunpack.i.l.bf16 %v1020_v48 }
 0x104   :  { %v1022_v53 = vpop.permute.xlu0 %841  ;;  %v1024_v54 = vpop.permute.xlu1 %100 }
 0x105   :  { %v843_v39 = vunpack.i.l.bf16 %v1022_v53 }
 0x107   :  { %v75_v2 = vsel %vm25_vm0, %v839_v28, %v843_v39  ;;  %v844_v39 = vunpack.i.h.bf16 %v1022_v53 }
 0x108   :  { %v213_v60 = vpop.permute.xlu0 %212  ;;  %v847_v61 = vpop.permute.xlu1 %846 }
 0x109   :  { %v848_v63 = vunpack.i.l.bf16 %v847_v61  ;;  %v216_v9 = vrot.slane %v213_v60, 4  ;;  %v849_v30 = vunpack.i.h.bf16 %v847_v61  ;;  %v104_v61 = vrot.slane %v1024_v54, 4 }
 0x10b   :  { %v231_v7 = vsel %vm229_vm1, %v814_v49, %v848_v63  ;;  %v218_v29 = vsel %vm106_vm8, %v216_v9, %v217_v1  ;;  %v124_v1 = vsel %vm122_vm7, %v828_v25, %v829_v24 }
 0x10c   :  { %v103_v10 = vpop.permute.xlu0 %102  ;;  %v852_v11 = vpop.permute.xlu1 %851  ;;  %v235_v12 = vsel %vm1033_vm5, %v231_v7, 0.0  ;;  %v220_v43 = vsel %vm219_vm9, %v213_v60, %v218_v29  ;;  %v74_v7 = vsel %vm25_vm0, %v838_v38, %v839_v28 }
 0x10d   :  { %v853_v13 = vunpack.i.l.bf16 %v852_v11  ;;  %v771_v15 = vpack.c.bf16 %v235_v12, %v235_v12  ;;  %v854_v41 = vunpack.i.h.bf16 %v852_v11  ;;  %v105_v46 = vrot.slane %v103_v10, 4 }
 0x10e   :  { %v78_v29 = vsel %vm1039_vm6, %v74_v7, 0.0 }
 0x10f   :  { %v194_v26 = vsel %vm192_vm3, %v819_v57, %v853_v13  ;;  %733 = vmatprep.subr.msk.bf16.mxu0 %vm106_vm8, %v771_v15  ;;  %v107_v8 = vsel %vm106_vm8, %v104_v61, %v105_v46 }
 0x110   :  { %v857_v31 = vpop.permute.xlu0 %856  ;;  %v862_v32 = vpop.permute.xlu1 %861  ;;  %566 = vmatpush1.bf16.msra.mxu0 %v548_v27  ;;  %v198_v33 = vsel %vm1048_vm10, %v194_v26, 0.0  ;;  %v79_v26 = vsel %vm1048_vm10, %v75_v2, 0.0 }
 0x111   :  { %v859_v34 = vunpack.i.h.bf16 %v857_v31  ;;  %v858_v35 = vunpack.i.l.bf16 %v857_v31  ;;  %v864_v36 = vunpack.i.h.bf16 %v862_v32  ;;  %v863_v37 = vunpack.i.l.bf16 %v862_v32 }
 0x112   :  { %v747_v42 = vpack.c.bf16 %v198_v33, %v197_v23 }
 0x113   :  { %v413_v49 = vsel %vm229_vm1, %v858_v35, %v859_v34  ;;  %v412_v50 = vsel %vm229_vm1, %v849_v30, %v858_v35  ;;  %v377_v51 = vsel %vm192_vm3, %v854_v41, %v863_v37  ;;  %v378_v60 = vsel %vm192_vm3, %v863_v37, %v864_v36  ;;  %vm780_vm1 = vmpackc.low %vm1048_vm10, %vm1033_vm5 }
 0x114   :  { %v872_v52 = vpop.permute.xlu0 %871  ;;  %v867_v56 = vpop.permute.xlu1 %866  ;;  %v726_v57 = vcombine.high %v747_v42, %v220_v43  ;;  %v725_v58 = vcombine.low %v747_v42, %v220_v43  ;;  %v417_v48 = vsel %vm1033_vm5, %v413_v49, 0.0  ;;  %v416_v6 = vsel %vm1026_vm2, %v412_v50, 0.0  ;;  %vm783_vm3 = vmpackc.low %vm1039_vm6, %vm1026_vm2 }
 0x115   :  { %v868_v62 = vunpack.i.l.bf16 %v867_v56  ;;  %v773_v19 = vpack.c.bf16 %v417_v48, %v417_v48  ;;  %v381_v10 = vsel %vm1039_vm6, %v377_v51, 0.0  ;;  %v873_v11 = vunpack.i.l.bf16 %v872_v52 }
 0x116   :  { %567 = vmatprep.subr.bf16.mxu0 %v726_v57  ;;  %v869_v12 = vunpack.i.h.bf16 %v867_v56  ;;  %v382_v16 = vsel %vm1048_vm10, %v378_v60, 0.0  ;;  %v772_v24 = vpack.c.bf16 %v416_v6, %v416_v6  ;;  %v874_v28 = vunpack.i.h.bf16 %v872_v52 }
 0x117   :  { %v171_v9 = vsel %vm170_vm4, %v868_v62, %v823_v3  ;;  %568 = vmatpush1.bf16.msra.mxu0 %v725_v58  ;;  %735 = vmatprep.subr.msk.bf16.mxu1 %vm106_vm8, %v773_v19  ;;  %v109_v30 = vsel %vm108_vm12, %v1024_v54, %v107_v8  ;;  %v757_v31 = vpack.c.bf16 %v382_v16, %v381_v10 }
 0x118   :  { %v778_v13 = vpack.c.bf16 %v171_v9, %v967_v18  ;;  %776 = vmatprep.subr.msk.bf16.mxu0 %vm1082_vm14, %v775_v59  ;;  %v397_v15 = vpop.permute.xlu0 %396  ;;  %v1105_v44 = vpop.permute.xlu1 %876  ;;  %v146_v18 = vsel %vm144_vm11, %v833_v22, %v834_v17  ;;  %v554_v33 = vsel %vm106_vm8, %v772_v24, 0  ;;  %v357_v34 = vsel %vm170_vm4, %v869_v12, %v873_v11  ;;  %v427_v11 = vld [vmem:[%s1208_s3] sm:$0xf] }
 0x119   :  { %v400_v23 = vrot.slane %v397_v15, 4  ;;  %v781_v27 = vpack.c.bf16 %v146_v18, %v124_v1  ;;  %v878_v32 = vunpack.i.l.bf16 %v1105_v44  ;;  %607 = vmatpush1.bf16.msra.mxu1 %v554_v33  ;;  %v356_v43 = vsel %vm170_vm4, %v874_v28, %v869_v12 }
 0x11a   :  { %v787_v46 = vpack.c.bf16 %v357_v34, %v973_v21  ;;  %v879_v53 = vunpack.i.h.bf16 %v1105_v44 }
 0x11b   :  { %v402_v17 = vsel %vm106_vm8, %v400_v23, %v401_v5  ;;  %779 = vmatpush1.bf16.msk.msra.mxu0 %vm1110_vm15, %v778_v13  ;;  %v740_v5 = vpack.c.bf16 %v79_v26, %v78_v29  ;;  %v123_v49 = vsel %vm122_vm7, %v878_v32, %v828_v25 }
 0x11c   :  { %v403_v35 = vsel %vm219_vm9, %v397_v15, %v402_v17  ;;  %782 = vmatprep.subr.msk.bf16.mxu0 %vm780_vm1, %v781_v27  ;;  %v882_v40 = vpop.permute.xlu0 %881  ;;  %v887_v54 = vpop.permute.xlu1 %886 }
 0x11d   :  { %v727_v36 = vcombine.low %v757_v31, %v403_v35  ;;  %v728_v37 = vcombine.high %v757_v31, %v403_v35  ;;  %v883_v38 = vunpack.i.l.bf16 %v882_v40  ;;  %v888_v41 = vunpack.i.l.bf16 %v887_v54 }
 0x11e   :  { %v714_v42 = vcombine.high %v740_v5, %v109_v30  ;;  %v884_v51 = vunpack.i.h.bf16 %v882_v40  ;;  %v889_v56 = vunpack.i.h.bf16 %v887_v54  ;;  %v713_v2 = vcombine.low %v740_v5, %v109_v30 }
 0x11f   :  { %v145_v50 = vsel %vm144_vm11, %v883_v38, %v833_v22  ;;  %608 = vmatprep.subr.bf16.mxu1 %v728_v37  ;;  %v790_v22 = vpack.c.bf16 %v356_v43, %v971_v20  ;;  %v311_v48 = vsel %vm122_vm7, %v879_v53, %v888_v41 }
 0x120   :  { %v784_v52 = vpack.c.bf16 %v145_v50, %v123_v49  ;;  %v892_v21 = vpop.permute.xlu0 %891  ;;  %v897_v57 = vpop.permute.xlu1 %896  ;;  %609 = vmatpush1.bf16.msra.mxu1 %v727_v36  ;;  %v310_v7 = vsel %vm122_vm7, %v889_v56, %v879_v53 }
 0x121   :  { %v894_v47 = vunpack.i.h.bf16 %v892_v21  ;;  %v893_v25 = vunpack.i.l.bf16 %v892_v21  ;;  %v899_v58 = vunpack.i.h.bf16 %v897_v57  ;;  %v898_v45 = vunpack.i.l.bf16 %v897_v57  ;;  %788 = vmatprep.subr.msk.bf16.mxu1 %vm1082_vm14, %v787_v46 }
 0x122   :  { %785 = vmatpush1.bf16.msk.msra.mxu0 %vm783_vm3, %v784_v52 }
 0x123   :  { %v331_v59 = vsel %vm144_vm11, %v894_v47, %v884_v51  ;;  %v332_v61 = vsel %vm144_vm11, %v884_v51, %v893_v25  ;;  %v268_v60 = vsel %vm25_vm0, %v844_v39, %v898_v45  ;;  %v269_v62 = vsel %vm25_vm0, %v898_v45, %v899_v58  ;;  %573 = vmatprep.subr.bf16.mxu0 %v714_v42 }
 0x124   :  { %v793_v63 = vpack.c.bf16 %v332_v61, %v311_v48  ;;  %v295_v1 = vpop.permute.xlu0 %294  ;;  %v297_v20 = vpop.permute.xlu1 %296  ;;  %791 = vmatpush1.bf16.msk.msra.mxu1 %vm1110_vm15, %v790_v22  ;;  %v272_v19 = vsel %vm1039_vm6, %v268_v60, 0.0  ;;  %v273_v6 = vsel %vm1048_vm10, %v269_v62, 0.0  ;;  %v796_v10 = vpack.c.bf16 %v331_v59, %v310_v7 }
 0x125   :  { %v298_v8 = vrot.slane %v295_v1, 4  ;;  %v299_v9 = vrot.slane %v297_v20, 4  ;;  %vm542_vm0 = vcmask 588800   ;;  %v750_v13 = vpack.c.bf16 %v273_v6, %v272_v19 }
 0x126   :  { %574 = vmatpush1.bf16.msra.mxu0 %v713_v2  ;;  %794 = vmatprep.subr.msk.bf16.mxu1 %vm780_vm1, %v793_v63 }
 0x127   :  { %v300_v12 = vsel %vm106_vm8, %v298_v8, %v299_v9 }
 0x128   :  { %797 = vmatpush1.bf16.msk.msra.mxu1 %vm783_vm3, %v796_v10  ;;  %v301_v14 = vsel %vm108_vm12, %v295_v1, %v300_v12 }
 0x129   :  { %734 = vmatmul.mubr.msk.bf16.vlgmr.msra.gmra.mxu0 %vm542_vm0, %v427_v11  ;;  %v716_v0 = vcombine.high %v750_v13, %v301_v14  ;;  %v715_v15 = vcombine.low %v750_v13, %v301_v14 }
 0x12b   :  { %614 = vmatprep.subr.bf16.mxu1 %v716_v0 }
 0x12c   :  { %615 = vmatpush1.bf16.msra.mxu1 %v715_v15 }
 0x12f   :  { %736 = vmatmul.mubr.msk.bf16.vlgmr.msra.gmra.mxu1 %vm542_vm0, %v427_v11 }
 0x131   :  { %v450_v16 = vpop.permute.xlu0 %449 }
 0x1e9   :  { %v593_v44 = vpop.f32.mrf.mxu0 }
 0x1ea   :  { %v594_v3 = vadd.f32 %v593_v44, %v450_v16 }
 0x1eb   :  { %v595_v18 = vpop.f32.mrf.mxu0 }
 0x1ec   :  { %v596_v23 = vadd.f32 %v595_v18, %v450_v16  ;;  %v641_v26 = vmax.f32 %v594_v3, 0.0 }
 0x1ed   :  { %v597_v24 = vpop.f32.mrf.mxu0 }
 0x1ee   :  { %v642_v4 = vmax.f32 %v596_v23, 0.0  ;;  %v670_v17 = vmul.f32 %v641_v26, %v641_v26 }
 0x1ef   :  { %v598_v27 = vpop.f32.mrf.mxu0  ;;  %v634_v55 = vpop.f32.mrf.mxu1 }
 0x1f0   :  { %v760_v28 = vpack.c.bf16 %v642_v4, %v641_v26  ;;  %v671_v29 = vmul.f32 %v642_v4, %v642_v4  ;;  %v635_v30 = vadd.f32 %v634_v55, %v450_v16  ;;  %v664_v34 = vadd.f32 %v642_v4, %v641_v26 }
 0x1f1   :  { %v636_v31 = vpop.f32.mrf.mxu1 }
 0x1f2   :  { %653 = vst [vmem:[%s1209_s5] sm:$0xff] %v760_v28  ;;  %v643_v32 = vmax.f32 %v635_v30, 0.0  ;;  %v637_v33 = vadd.f32 %v636_v31, %v450_v16  ;;  %v674_v36 = vadd.f32 %v671_v29, %v670_v17 }
 0x1f3   :  { %v638_v35 = vpop.f32.mrf.mxu1 }
 0x1f4   :  { %v644_v40 = vmax.f32 %v637_v33, 0.0  ;;  %v665_v54 = vadd.f32 %v664_v34, %v643_v32  ;;  %v672_v5 = vmul.f32 %v643_v32, %v643_v32 }
 0x1f5   :  { %v639_v37 = vpop.f32.mrf.mxu1 }
 0x1f6   :  { %v761_v38 = vpack.c.bf16 %v644_v40, %v643_v32  ;;  %v666_v39 = vadd.f32 %v665_v54, %v644_v40  ;;  %v673_v41 = vmul.f32 %v644_v40, %v644_v40  ;;  %v675_v42 = vadd.f32 %v674_v36, %v672_v5 }
 0x1f8   :  { %739 = vst [vmem:[%s1209_s5 + $0x8] sm:$0xff] %v761_v38  ;;  %667 = vadd.xlane.f32.xlu1 %v666_v39  ;;  %v676_v43 = vadd.f32 %v675_v42, %v673_v41 }
 0x1fa   :  { %677 = vadd.xlane.f32.xlu0 %v676_v43 }
 0x281   :  { %v668_v46 = vpop.xlane.xlu1 %667 }
 0x282   :  { %669 = vst.msk [vmem:[%s1210_s6] sm:$0xff] %vm144_vm11, %v668_v46 }
 0x283   :  { %v678_v49 = vpop.xlane.xlu0 %677 }
 0x284   :  { %679 = vst.msk [vmem:[%s1211_s7] sm:$0xff] %vm144_vm11, %v678_v49 }

// kernel: double_conv_bn_relu.2
= control target key start
LH: loop header
LB: loop body
LE: loop exit
PB: predicated region body
PF: predicated region fallthrough
CT: control target
= control target key end

     0   :  { %v866_v0 = vmov 0   ;;  %v867_v2 = vmov 0.0   ;;  %vm25_vm0 = vcmask 134144   ;;  %v27_v4 = vlaneseq  ;;  %s869_s30 = smov 127   ;;  %s870_s8 = smov 111   ;;  %s1105_s1 = inlined_call_operand.vmem [shape: f32[4,1], index: 1, kind: input, shape index: {}]   ;;  %s1106_s2 = inlined_call_operand.vmem [shape: f32[4,1], index: 2, kind: input, shape index: {}]   ;;  %s1107_s0 = inlined_call_operand.vmem [shape: f32[2,4,256], index: 0, kind: input, shape index: {}]   ;;  %s1108_s4 = inlined_call_operand.vmem [shape: f32[8,1], index: 4, kind: input, shape index: {}]   ;;  %s1109_s3 = inlined_call_operand.vmem [shape: bf16[8,36], index: 3, kind: input, shape index: {}]   ;;  %s1110_s5 = inlined_call_operand.vmem [shape: bf16[2,8,256], index: 5, kind: output, shape index: {0}]   ;;  %s1111_s6 = inlined_call_operand.vmem [shape: f32[1,8,1], index: 6, kind: output, shape index: {1}]   ;;  %s1112_s7 = inlined_call_operand.vmem [shape: f32[1,8,1], index: 7, kind: output, shape index: {2}]  }
   0x1   :  { %740 = vset.pattern.permute.xlu0 %v866_v0  ;;  %v36_v1 = vld [vmem:[%s1105_s1] sm:$0xf]  ;;  %24 = vst [vmem:[#allocation2] sm:$0xf] %v867_v2  ;;  %566 = vmatprep.mubr.bf16.mxu0 %v866_v0  ;;  %26 = vst.msk [vmem:[#allocation2 + $0xc] sm:$0xf] %vm25_vm0, %v867_v2 }
   0x2   :  { %41 = vperm.xlu0 %740, %v36_v1   ;;  %607 = vmatprep.mubr.bf16.mxu1 %v866_v0  ;;  %v37_v3 = vld [vmem:[%s1106_s2] sm:$0xf]  ;;  %v868_v5 = vmov 839922192   ;;  %v47_v8 = vshrl.u32 %v27_v4, 7  ;;  %v677_v17 = vld [vmem:[%s1107_s0 + $0x8] sm:$0xff] }
   0x3   :  { %846 = vset.pattern.permute.xlu1 %v866_v0  ;;  %v44_v6 = vunpack.c.l.s4 %v868_v5  ;;  %v38_v12 = vld [vmem:[%s1107_s0] sm:$0xff]  ;;  %s871_s9 = smov 112   ;;  %s872_s0 = smov 1   ;;  %v28_v47 = vand.u32 127, %v27_v4  ;;  %vm155_vm3 = vcmask 7168   ;;  %vm248_vm4 = vcmask 908288  }
   0x4   :  { %s873_s10 = smov 113   ;;  %s874_s11 = smov 17   ;;  %v461_v44 = vld [vmem:[%s1108_s4] sm:$0xff]  ;;  %vm81_vm5 = vcmask 138240   ;;  %vm117_vm6 = vcmask 1043456   ;;  %vm119_vm7 = vcmask 130048  }
   0x5   :  { %v45_v7 = vunpack.c.0.s8 %v44_v6  ;;  %s875_s12 = smov 16   ;;  %s876_s13 = smov 15   ;;  %v29_v50 = vadd.s32 128, %v28_v47  ;;  %v30_v54 = vand.u32 15, %v28_v47  ;;  %vm182_vm9 = vcmask 1039360  }
   0x6   :  { %54 = vperm.xlu0 %740, %v37_v3   ;;  %vm227_vm11 = vcmask 916480   ;;  %vm133_vm12 = vcmask 121856   ;;  %vm205_vm13 = vcmask 924672   ;;  %vm521_vm14 = vcmask 1041408   ;;  %v450_v59 = vld [vmem:[%s1109_s3] sm:$0xf] }
   0x7   :  { %v48_v9 = vsub.s32 %v45_v7, %v47_v8  ;;  %v31_v53 = vand.u32 15, %v29_v50  ;;  %vm964_vm1 = vcmp.gt.s32.totalorder %v30_v54, 0  ;;  %vm976_vm8 = vcmp.lt.s32.totalorder %v30_v54, 15 }
   0x8   :  { %vm517_vm15 = vcmask 293888  }
   0x9   :  { %vm968_vm2 = vcmp.gt.s32.totalorder %v31_v53, 0  ;;  %vm996_vm10 = vcmp.lt.s32.totalorder %v31_v53, 15 }
  0x7d   :  { %v42_v10 = vpop.permute.xlu0 %41 }
  0x7e   :  { %v49_v11 = vrot.slane %v42_v10, %v48_v9 }
  0x80   :  { %v51_v14 = vmul.f32 %v49_v11, %v38_v12  ;;  %v266_v18 = vmul.f32 %v677_v17, %v49_v11 }
  0x81   :  { %v55_v13 = vpop.permute.xlu0 %54 }
  0x82   :  { %v62_v15 = vrot.slane %v55_v13, %v48_v9 }
  0x84   :  { %v64_v16 = vadd.f32 %v62_v15, %v51_v14  ;;  %v267_v19 = vadd.f32 %v266_v18, %v62_v15 }
  0x86   :  { %65 = vst [vmem:[#allocation2 + $0x4] sm:$0xff] %v64_v16 }
  0x8d   :  { %v66_v20 = vld [vmem:[#allocation2] sm:$0xff]  ;;  %v67_v21 = vld [vmem:[#allocation2 + $0x8] sm:$0xff] }
  0x8e   :  { %v74_v22 = vcombine.high %v66_v20, %v66_v20  ;;  %268 = vst [vmem:[#allocation2 + $0x4] sm:$0xff] %v267_v19  ;;  %v709_v28 = vpack.c.bf16 %v67_v21, %v67_v21  ;;  %v175_v35 = vcombine.high %v67_v21, %v67_v21 }
  0x90   :  { %v746_v23 = vpack.i.bf16 %v67_v21, %v74_v22  ;;  %v712_v24 = vpack.c.bf16 %v67_v21, %v74_v22  ;;  %v761_v25 = vpack.i.bf16 %v74_v22, %v66_v20  ;;  %v110_v31 = vrot.slane %v709_v28, 6 }
  0x91   :  { %v708_v32 = vpack.c.bf16 %v74_v22, %v66_v20 }
  0x92   :  { %747 = vrot.lane.b32.xlu0 %v746_v23, %s869_s30  ;;  %742 = vrot.lane.b32.xlu1 %v746_v23, %s870_s8  ;;  %174 = vst [vmem:[#allocation3 + $0x30] sm:$0x33] %v712_v24 }
  0x93   :  { %v109_v34 = vrot.slane %v708_v32, 6 }
  0x95   :  { %v269_v26 = vld [vmem:[#allocation2] sm:$0xff]  ;;  %v270_v29 = vld [vmem:[#allocation2 + $0x8] sm:$0xff] }
  0x96   :  { %752 = vrot.lane.b32.xlu0 %v746_v23, %s871_s9  ;;  %762 = vrot.lane.b32.xlu1 %v761_v25, %s872_s0  ;;  %v273_v27 = vcombine.high %v269_v26, %v269_v26  ;;  %v776_v33 = vpack.i.bf16 %v269_v26, %v67_v21  ;;  %v365_v37 = vcombine.high %v270_v29, %v270_v29 }
  0x97   :  { %v719_v42 = vpack.c.bf16 %v270_v29, %v270_v29 }
  0x98   :  { %v722_v30 = vpack.c.bf16 %v270_v29, %v273_v27  ;;  %v791_v36 = vpack.i.bf16 %v273_v27, %v175_v35  ;;  %v811_v38 = vpack.i.bf16 %v365_v37, %v270_v29  ;;  %v831_v39 = vpack.i.bf16 %v270_v29, %v273_v27 }
  0x99   :  { %v718_v40 = vpack.c.bf16 %v273_v27, %v269_v26  ;;  %v308_v43 = vrot.slane %v719_v42, 6 }
  0x9a   :  { %757 = vrot.lane.b32.xlu0 %v746_v23, %s873_s10  ;;  %767 = vrot.lane.b32.xlu1 %v761_v25, %s874_s11  ;;  %364 = vst [vmem:[#allocation3 + $0x40] sm:$0x33] %v722_v30 }
  0x9b   :  { %v307_v41 = vrot.slane %v718_v40, 6 }
  0x9e   :  { %113 = vrot.lane.b32.xlu0 %v110_v31, %s875_s12  ;;  %772 = vrot.lane.b32.xlu1 %v761_v25, %s876_s13 }
  0xa2   :  { %777 = vrot.lane.b32.xlu0 %v776_v33, %s872_s0  ;;  %111 = vrot.lane.b32.xlu1 %v109_v34, %s875_s12 }
  0xa6   :  { %782 = vrot.lane.b32.xlu0 %v776_v33, %s874_s11  ;;  %792 = vrot.lane.b32.xlu1 %v791_v36, %s870_s8 }
  0xaa   :  { %787 = vrot.lane.b32.xlu0 %v776_v33, %s876_s13  ;;  %797 = vrot.lane.b32.xlu1 %v791_v36, %s869_s30 }
  0xae   :  { %812 = vrot.lane.b32.xlu0 %v811_v38, %s870_s8  ;;  %802 = vrot.lane.b32.xlu1 %v791_v36, %s871_s9 }
  0xb2   :  { %822 = vrot.lane.b32.xlu0 %v811_v38, %s871_s9  ;;  %807 = vrot.lane.b32.xlu1 %v791_v36, %s873_s10 }
  0xb6   :  { %832 = vrot.lane.b32.xlu0 %v831_v39, %s872_s0  ;;  %817 = vrot.lane.b32.xlu1 %v811_v38, %s869_s30 }
  0xba   :  { %309 = vrot.lane.b32.xlu0 %v307_v41, %s875_s12  ;;  %827 = vrot.lane.b32.xlu1 %v811_v38, %s873_s10 }
  0xbe   :  { %842 = vrot.lane.b32.xlu0 %v831_v39, %s876_s13  ;;  %837 = vrot.lane.b32.xlu1 %v831_v39, %s874_s11 }
  0xc2   :  { %311 = vrot.lane.b32.xlu1 %v308_v43, %s875_s12 }
  0xc6   :  { %464 = vperm.xlu1 %846, %v461_v44  }
 0x104   :  { %v955_v45 = vpop.permute.xlu0 %747  ;;  %v743_v46 = vpop.permute.xlu1 %742 }
 0x105   :  { %v745_v61 = vunpack.i.h.bf16 %v743_v46  ;;  %v744_v62 = vunpack.i.l.bf16 %v743_v46  ;;  %v750_v8 = vunpack.i.h.bf16 %v955_v45  ;;  %v749_v9 = vunpack.i.l.bf16 %v955_v45 }
 0x107   :  { %v249_v10 = vsel %vm248_vm4, %v744_v62, %v745_v61  ;;  %v183_v25 = vsel %vm182_vm9, %v749_v9, %v750_v8 }
 0x108   :  { %v958_v48 = vpop.permute.xlu0 %752  ;;  %v763_v49 = vpop.permute.xlu1 %762  ;;  %v253_v28 = vsel %vm976_vm8, %v249_v10, 0.0  ;;  %v187_v42 = vsel %vm976_vm8, %v183_v25, 0.0 }
 0x109   :  { %v765_v57 = vunpack.i.h.bf16 %v763_v49  ;;  %v764_v58 = vunpack.i.l.bf16 %v763_v49  ;;  %v755_v38 = vunpack.i.h.bf16 %v958_v48  ;;  %v754_v39 = vunpack.i.l.bf16 %v958_v48 }
 0x10b   :  { %v156_v3 = vsel %vm155_vm3, %v764_v58, %v765_v57 }
 0x10c   :  { %v960_v51 = vpop.permute.xlu0 %757  ;;  %v768_v52 = vpop.permute.xlu1 %767  ;;  %v160_v13 = vsel %vm964_vm1, %v156_v3, 0.0 }
 0x10d   :  { %v770_v63 = vunpack.i.h.bf16 %v768_v52  ;;  %v769_v0 = vunpack.i.l.bf16 %v768_v52  ;;  %v760_v43 = vunpack.i.h.bf16 %v960_v51  ;;  %v759_v44 = vunpack.i.l.bf16 %v960_v51 }
 0x10f   :  { %v82_v14 = vsel %vm81_vm5, %v769_v0, %v770_v63 }
 0x110   :  { %v114_v55 = vpop.permute.xlu0 %113  ;;  %v962_v56 = vpop.permute.xlu1 %772  ;;  %v86_v29 = vsel %vm964_vm1, %v82_v14, 0.0 }
 0x111   :  { %v116_v4 = vrot.slane %v114_v55, 4  ;;  %v775_v19 = vunpack.i.h.bf16 %v962_v56  ;;  %v774_v20 = vunpack.i.l.bf16 %v962_v56  ;;  %v228_v56 = vsel %vm227_vm11, %v754_v39, %v755_v38 }
 0x113   :  { %v134_v34 = vsel %vm133_vm12, %v774_v20, %v775_v19 }
 0x114   :  { %v972_v1 = vpop.permute.xlu0 %777  ;;  %v112_v2 = vpop.permute.xlu1 %111  ;;  %v138_v46 = vsel %vm976_vm8, %v134_v34, 0.0 }
 0x115   :  { %v779_v5 = vunpack.i.l.bf16 %v972_v1  ;;  %v115_v6 = vrot.slane %v112_v2, 4  ;;  %v780_v14 = vunpack.i.h.bf16 %v972_v1 }
 0x117   :  { %v157_v11 = vsel %vm155_vm3, %v765_v57, %v779_v5  ;;  %v118_v12 = vsel %vm117_vm6, %v115_v6, %v116_v4 }
 0x118   :  { %v161_v15 = vsel %vm968_vm2, %v157_v11, 0.0  ;;  %v120_v16 = vsel %vm119_vm7, %v112_v2, %v118_v12  ;;  %v991_v17 = vpop.permute.xlu0 %782  ;;  %v793_v18 = vpop.permute.xlu1 %792 }
 0x119   :  { %v711_v21 = vpack.c.bf16 %v161_v15, %v160_v13  ;;  %122 = vst [vmem:[#allocation3 + $0x18] sm:$0xcc] %v120_v16  ;;  %v784_v22 = vunpack.i.l.bf16 %v991_v17  ;;  %v794_v24 = vunpack.i.l.bf16 %v793_v18  ;;  %v795_v47 = vunpack.i.h.bf16 %v793_v18 }
 0x11b   :  { %v169_v26 = vrot.slane %v711_v21, 6  ;;  %v83_v27 = vsel %vm81_vm5, %v770_v63, %v784_v22  ;;  %v250_v31 = vsel %vm248_vm4, %v745_v61, %v794_v24  ;;  %v206_v61 = vsel %vm205_vm13, %v759_v44, %v760_v43 }
 0x11c   :  { %v87_v30 = vsel %vm968_vm2, %v83_v27, 0.0  ;;  %v1009_v32 = vpop.permute.xlu0 %787  ;;  %v1011_v33 = vpop.permute.xlu1 %797  ;;  %v254_v36 = vsel %vm996_vm10, %v250_v31, 0.0  ;;  %v210_v13 = vsel %vm964_vm1, %v206_v61, 0.0 }
 0x11d   :  { %171 = vst [vmem:[#allocation3] sm:$0xcc] %v169_v26  ;;  %v707_v35 = vpack.c.bf16 %v87_v30, %v86_v29  ;;  %v789_v37 = vunpack.i.l.bf16 %v1009_v32  ;;  %v716_v40 = vpack.c.bf16 %v254_v36, %v253_v28  ;;  %v799_v41 = vunpack.i.l.bf16 %v1011_v33 }
 0x11e   :  { %v800_v16 = vunpack.i.h.bf16 %v1011_v33 }
 0x11f   :  { %96 = vst [vmem:[#allocation3 + $0x18] sm:$0x33] %v707_v35  ;;  %v135_v45 = vsel %vm133_vm12, %v775_v19, %v789_v37  ;;  %263 = vst [vmem:[#allocation3 + $0x48] sm:$0x33] %v716_v40  ;;  %v184_v49 = vsel %vm182_vm9, %v750_v8, %v799_v41 }
 0x120   :  { %v139_v48 = vsel %vm996_vm10, %v135_v45, 0.0  ;;  %v813_v50 = vpop.permute.xlu0 %812  ;;  %v803_v52 = vpop.permute.xlu1 %802  ;;  %v188_v54 = vsel %vm996_vm10, %v184_v49, 0.0 }
 0x121   :  { %v710_v53 = vpack.c.bf16 %v139_v48, %v138_v46  ;;  %v815_v51 = vunpack.i.h.bf16 %v813_v50  ;;  %v814_v55 = vunpack.i.l.bf16 %v813_v50  ;;  %v713_v57 = vpack.c.bf16 %v188_v54, %v187_v42 }
 0x122   :  { %v804_v58 = vunpack.i.l.bf16 %v803_v52  ;;  %v805_v0 = vunpack.i.h.bf16 %v803_v52  ;;  %v785_v54 = vunpack.i.h.bf16 %v991_v17 }
 0x123   :  { %148 = vst [vmem:[#allocation3] sm:$0x33] %v710_v53  ;;  %v435_v62 = vsel %vm248_vm4, %v795_v47, %v814_v55  ;;  %v436_v63 = vsel %vm248_vm4, %v814_v55, %v815_v51  ;;  %v196_v2 = vrot.slane %v713_v57, 6  ;;  %v790_v57 = vunpack.i.h.bf16 %v1009_v32 }
 0x124   :  { %v439_v3 = vsel %vm976_vm8, %v435_v62, 0.0  ;;  %v440_v4 = vsel %vm996_vm10, %v436_v63, 0.0  ;;  %v229_v5 = vsel %vm227_vm11, %v755_v38, %v804_v58  ;;  %v823_v6 = vpop.permute.xlu0 %822  ;;  %v808_v8 = vpop.permute.xlu1 %807 }
 0x125   :  { %v726_v9 = vpack.c.bf16 %v440_v4, %v439_v3  ;;  %v715_v10 = vpack.c.bf16 %v229_v5, %v228_v56  ;;  %v825_v11 = vunpack.i.h.bf16 %v823_v6  ;;  %v824_v12 = vunpack.i.l.bf16 %v823_v6  ;;  %198 = vst [vmem:[#allocation3 + $0x30] sm:$0xcc] %v196_v2 }
 0x126   :  { %v809_v15 = vunpack.i.l.bf16 %v808_v8  ;;  %v459_v21 = vld [vmem:[#allocation3 + $0x48] sm:$0x33]  ;;  %v810_v48 = vunpack.i.h.bf16 %v808_v8 }
 0x127   :  { %449 = vst [vmem:[#allocation3 + $0x28] sm:$0x33] %v726_v9  ;;  %v239_v18 = vrot.slane %v715_v10, 6  ;;  %v415_v19 = vsel %vm227_vm11, %v805_v0, %v824_v12  ;;  %v416_v20 = vsel %vm227_vm11, %v824_v12, %v825_v11  ;;  %v697_v27 = vcombine.high %v459_v21, %v459_v21 }
 0x128   :  { %v725_v22 = vpack.c.bf16 %v416_v20, %v415_v19  ;;  %v207_v24 = vsel %vm205_vm13, %v760_v43, %v809_v15  ;;  %v833_v25 = vpop.permute.xlu0 %832  ;;  %v818_v26 = vpop.permute.xlu1 %817  ;;  %v696_v28 = vcombine.low %v459_v21, %v459_v21 }
 0x129   :  { %241 = vst [vmem:[#allocation3 + $0x20] sm:$0xcc] %v239_v18  ;;  %v211_v1 = vsel %vm968_vm2, %v207_v24, 0.0  ;;  %v835_v29 = vunpack.i.h.bf16 %v833_v25  ;;  %v834_v30 = vunpack.i.l.bf16 %v833_v25  ;;  %v820_v31 = vunpack.i.h.bf16 %v818_v26  ;;  %700 = vmatprep.subr.msk.bf16.mxu0 %vm521_vm14, %v697_v27 }
 0x12a   :  { %v426_v33 = vrot.slane %v725_v22, 6  ;;  %v714_v34 = vpack.c.bf16 %v211_v1, %v210_v13  ;;  %v819_v35 = vunpack.i.l.bf16 %v818_v26  ;;  %v523_v36 = vsel %vm521_vm14, %v696_v28, 0  ;;  %v857_v25 = vld [vmem:[#allocation3 + $0x1c] ss:$-24 sps:$4 sm:$0xff]   ;;  %v859_v27 = vld [vmem:[#allocation3 + $0x18] ss:$-24 sps:$4 sm:$0xff]  }
 0x12b   :  { %v346_v37 = vsel %vm155_vm3, %v780_v14, %v834_v30  ;;  %v347_v38 = vsel %vm155_vm3, %v834_v30, %v835_v29  ;;  %545 = vmatpush1.bf16.msra.mxu0 %v523_v36 }
 0x12c   :  { %428 = vst [vmem:[#allocation3 + $0x38] sm:$0xcc] %v426_v33  ;;  %220 = vst [vmem:[#allocation3 + $0x20] sm:$0x33] %v714_v34  ;;  %v350_v39 = vsel %vm964_vm1, %v346_v37, 0.0  ;;  %v351_v40 = vsel %vm968_vm2, %v347_v38, 0.0  ;;  %v372_v41 = vsel %vm182_vm9, %v800_v16, %v819_v35  ;;  %v373_v42 = vsel %vm182_vm9, %v819_v35, %v820_v31  ;;  %v310_v43 = vpop.permute.xlu0 %309  ;;  %v828_v44 = vpop.permute.xlu1 %827 }
 0x12d   :  { %v721_v45 = vpack.c.bf16 %v351_v40, %v350_v39  ;;  %v376_v46 = vsel %vm976_vm8, %v372_v41, 0.0  ;;  %v377_v47 = vsel %vm996_vm10, %v373_v42, 0.0  ;;  %v830_v50 = vunpack.i.h.bf16 %v828_v44 }
 0x12e   :  { %v723_v49 = vpack.c.bf16 %v377_v47, %v376_v46  ;;  %v829_v52 = vunpack.i.l.bf16 %v828_v44  ;;  %v460_v53 = vld [vmem:[#allocation3 + $0x28] sm:$0x33]  ;;  %v313_v9 = vrot.slane %v310_v43, 4 }
 0x12f   :  { %v359_v51 = vrot.slane %v721_v45, 6  ;;  %v699_v55 = vcombine.high %v460_v53, %v460_v53  ;;  %v698_v56 = vcombine.low %v460_v53, %v460_v53 }
 0x130   :  { %v385_v58 = vrot.slane %v723_v49, 6  ;;  %v394_v61 = vsel %vm205_vm13, %v810_v48, %v829_v52  ;;  %v395_v62 = vsel %vm205_vm13, %v829_v52, %v830_v50  ;;  %v843_v63 = vpop.permute.xlu0 %842  ;;  %v838_v0 = vpop.permute.xlu1 %837 }
 0x131   :  { %361 = vst [vmem:[#allocation3 + $0x10] sm:$0xcc] %v359_v51  ;;  %v398_v2 = vsel %vm964_vm1, %v394_v61, 0.0  ;;  %v399_v3 = vsel %vm968_vm2, %v395_v62, 0.0  ;;  %v845_v17 = vunpack.i.h.bf16 %v843_v63  ;;  %v844_v4 = vunpack.i.l.bf16 %v843_v63  ;;  %702 = vmatprep.subr.msk.bf16.mxu1 %vm521_vm14, %v699_v55 }
 0x132   :  { %387 = vst [vmem:[#allocation3 + $0x40] sm:$0xcc] %v385_v58  ;;  %v724_v32 = vpack.c.bf16 %v399_v3, %v398_v2  ;;  %v840_v5 = vunpack.i.h.bf16 %v838_v0  ;;  %v839_v6 = vunpack.i.l.bf16 %v838_v0  ;;  %v529_v8 = vsel %vm521_vm14, %v698_v56, 0 }
 0x133   :  { %v325_v10 = vsel %vm133_vm12, %v790_v57, %v844_v4  ;;  %v326_v11 = vsel %vm133_vm12, %v844_v4, %v845_v17  ;;  %586 = vmatpush1.bf16.msra.mxu1 %v529_v8  ;;  %v854_v12 = vld [vmem:[#allocation3 + $0x34] ss:$-16 sps:$4 sm:$0xff]   ;;  %v856_v13 = vld [vmem:[#allocation3 + $0x30] ss:$-16 sps:$4 sm:$0xff]  }
 0x134   :  { %408 = vst [vmem:[#allocation3 + $0x38] sm:$0x33] %v724_v32  ;;  %v329_v14 = vsel %vm976_vm8, %v325_v10, 0.0  ;;  %v330_v15 = vsel %vm996_vm10, %v326_v11, 0.0  ;;  %v280_v16 = vsel %vm81_vm5, %v785_v54, %v839_v6  ;;  %v281_v18 = vsel %vm81_vm5, %v839_v6, %v840_v5  ;;  %v312_v19 = vpop.permute.xlu1 %311  ;;  %546 = vmatprep.subr.bf16.mxu0 %v854_v12 }
 0x135   :  { %v720_v20 = vpack.c.bf16 %v330_v15, %v329_v14  ;;  %v284_v21 = vsel %vm964_vm1, %v280_v16, 0.0  ;;  %v285_v22 = vsel %vm968_vm2, %v281_v18, 0.0  ;;  %v314_v24 = vrot.slane %v312_v19, 4  ;;  %547 = vmatpush1.bf16.msra.mxu0 %v856_v13 }
 0x136   :  { %v717_v7 = vpack.c.bf16 %v285_v22, %v284_v21  ;;  %548 = vmatprep.subr.bf16.mxu0 %v857_v25 }
 0x137   :  { %339 = vst [vmem:[#allocation3 + $0x10] sm:$0x33] %v720_v20  ;;  %v315_v23 = vsel %vm117_vm6, %v313_v9, %v314_v24 }
 0x138   :  { %294 = vst [vmem:[#allocation3 + $0x8] sm:$0x33] %v717_v7  ;;  %v316_v26 = vsel %vm119_vm7, %v310_v43, %v315_v23 }
 0x139   :  { %318 = vst [vmem:[#allocation3 + $0x8] sm:$0xcc] %v316_v26  ;;  %549 = vmatpush1.bf16.msra.mxu0 %v859_v27 }
 0x13b   :  { %v860_v60 = vld [vmem:[#allocation3 + $0x44] ss:$-8 sps:$4 sm:$0xff]   ;;  %v862_v28 = vld [vmem:[#allocation3 + $0x40] ss:$-8 sps:$4 sm:$0xff]  }
 0x13c   :  { %701 = vmatmul.mubr.msk.bf16.vlgmr.msra.gmra.mxu0 %vm517_vm15, %v450_v59  ;;  %587 = vmatprep.subr.bf16.mxu1 %v860_v60 }
 0x13d   :  { %588 = vmatpush1.bf16.msra.mxu1 %v862_v28 }
 0x140   :  { %v863_v1 = vld [vmem:[#allocation3 + $0xc] ss:$8 sps:$4 sm:$0xff]   ;;  %v865_v29 = vld [vmem:[#allocation3 + $0x8] ss:$8 sps:$4 sm:$0xff]  }
 0x141   :  { %589 = vmatprep.subr.bf16.mxu1 %v863_v1  ;;  %v465_v30 = vpop.permute.xlu1 %464 }
 0x142   :  { %590 = vmatpush1.bf16.msra.mxu1 %v865_v29 }
 0x145   :  { %703 = vmatmul.mubr.msk.bf16.vlgmr.msra.gmra.mxu1 %vm517_vm15, %v450_v59 }
 0x1fc   :  { %v568_v31 = vpop.f32.mrf.mxu0 }
 0x1fd   :  { %v569_v33 = vadd.f32 %v568_v31, %v465_v30 }
 0x1fe   :  { %v570_v34 = vpop.f32.mrf.mxu0 }
 0x1ff   :  { %v571_v35 = vadd.f32 %v570_v34, %v465_v30  ;;  %v616_v36 = vmax.f32 %v569_v33, 0.0 }
 0x200   :  { %v572_v37 = vpop.f32.mrf.mxu0 }
 0x201   :  { %v617_v38 = vmax.f32 %v571_v35, 0.0  ;;  %v645_v43 = vmul.f32 %v616_v36, %v616_v36 }
 0x202   :  { %v573_v39 = vpop.f32.mrf.mxu0 }
 0x203   :  { %v727_v40 = vpack.c.bf16 %v617_v38, %v616_v36  ;;  %v646_v44 = vmul.f32 %v617_v38, %v617_v38  ;;  %v639_v48 = vadd.f32 %v617_v38, %v616_v36 }
 0x205   :  { %v609_v41 = vpop.f32.mrf.mxu1  ;;  %628 = vst [vmem:[%s1110_s5] sm:$0xff] %v727_v40  ;;  %v649_v54 = vadd.f32 %v646_v44, %v645_v43 }
 0x206   :  { %v610_v42 = vadd.f32 %v609_v41, %v465_v30 }
 0x207   :  { %v611_v45 = vpop.f32.mrf.mxu1 }
 0x208   :  { %v618_v46 = vmax.f32 %v610_v42, 0.0  ;;  %v612_v47 = vadd.f32 %v611_v45, %v465_v30 }
 0x209   :  { %v613_v49 = vpop.f32.mrf.mxu1 }
 0x20a   :  { %v619_v50 = vmax.f32 %v612_v47, 0.0  ;;  %v640_v52 = vadd.f32 %v639_v48, %v618_v46  ;;  %v647_v53 = vmul.f32 %v618_v46, %v618_v46 }
 0x20b   :  { %v614_v51 = vpop.f32.mrf.mxu1 }
 0x20c   :  { %v728_v55 = vpack.c.bf16 %v619_v50, %v618_v46  ;;  %v641_v56 = vadd.f32 %v640_v52, %v619_v50  ;;  %v648_v57 = vmul.f32 %v619_v50, %v619_v50  ;;  %v650_v58 = vadd.f32 %v649_v54, %v647_v53 }
 0x20e   :  { %706 = vst [vmem:[%s1110_s5 + $0x8] sm:$0xff] %v728_v55  ;;  %642 = vadd.xlane.f32.xlu0 %v641_v56  ;;  %v651_v61 = vadd.f32 %v650_v58, %v648_v57 }
 0x210   :  { %652 = vadd.xlane.f32.xlu1 %v651_v61 }
 0x297   :  { %v643_v62 = vpop.xlane.xlu0 %642 }
 0x298   :  { %644 = vst.msk [vmem:[%s1111_s6] sm:$0xff] %vm155_vm3, %v643_v62 }
 0x299   :  { %v653_v63 = vpop.xlane.xlu1 %652 }
 0x29a   :  { %654 = vst.msk [vmem:[%s1112_s7] sm:$0xff] %vm155_vm3, %v653_v63 }

</bundles_post_ra>
